<compile_context>
chip_gen: v5e
topology: v5e:2x2
jax: 0.10.0
libtpu: 0.0.40
codegen_flags: <defaults>
</compile_context>

<pallas_src>
import functools
import math

import jax
import jax.numpy as jnp
from jax.experimental import pallas as pl
from jax.experimental.pallas import tpu as pltpu

HIDDEN = 256
LOG_STD_MIN = -20.0
LOG_STD_MAX = 2.0
_HALF_LOG_2PI = 0.5 * math.log(2.0 * math.pi)
_LOG2 = math.log(2.0)


def _softplus(z):
    # numerically stable softplus
    return jnp.maximum(z, 0.0) + jnp.log(1.0 + jnp.exp(-jnp.abs(z)))


def _round_up(x, m):
    return ((x + m - 1) // m) * m


def _policy_kernel(obs_ref, *refs, max_action, deterministic):
    """Transposed layout: all activations are (features, bb) with bb in lanes."""
    if deterministic:
        eps_ref = None
        (w1_ref, b1_ref, w2_ref, b2_ref, w3_ref, b3_ref, w4_ref, b4_ref,
         act_ref, logp_ref) = refs
    else:
        (eps_ref, w1_ref, b1_ref, w2_ref, b2_ref, w3_ref, b3_ref, w4_ref,
         b4_ref, act_ref, logp_ref) = refs

    bf16 = jnp.bfloat16
    f32 = jnp.float32
    act_dim = act_ref.shape[0]          # (A, bb) output tile

    # base_network: 3 x (Linear + ReLU) + fused final Linear (mean|log_std),
    # all computed transposed: h_t = W^T @ x_t  ->  (out_features, bb).
    # bf16 MXU operands, f32 accumulation; epilogue stays f32.
    x = obs_ref[...]                     # bf16 (S, bb)
    h = jnp.maximum(
        jnp.dot(w1_ref[...], x, preferred_element_type=f32) + b1_ref[...], 0.0)
    h = jnp.maximum(
        jnp.dot(w2_ref[...], h.astype(bf16), preferred_element_type=f32) + b2_ref[...], 0.0)
    h = jnp.maximum(
        jnp.dot(w3_ref[...], h.astype(bf16), preferred_element_type=f32) + b3_ref[...], 0.0)
    head = jnp.dot(w4_ref[...], h.astype(bf16), preferred_element_type=f32) + b4_ref[...]
    # head: (2A, bb); log_std multiplier/offset already folded into w4/b4.

    mean = head[:act_dim, :]             # sublane split, no sub-128-lane slicing
    log_std = jnp.clip(head[act_dim:, :], LOG_STD_MIN, LOG_STD_MAX)

    if deterministic:
        # action = tanh(mean); Normal log-prob at the mean has z == 0.
        pre_tanh = mean
        normal_lp = -log_std - _HALF_LOG_2PI
    else:
        # rsample: pre_tanh = mean + std * eps ; z == eps exactly (no divide).
        std = jnp.exp(log_std)
        eps = eps_ref[...]               # f32 (A, bb), full-lane loads
        pre_tanh = mean + std * eps
        normal_lp = -0.5 * (eps * eps) - log_std - _HALF_LOG_2PI

    action = jnp.tanh(pre_tanh)
    # TanhTransform.log_abs_det_jacobian(x, y) = 2*(log2 - x - softplus(-2x))
    ladj = 2.0 * (_LOG2 - pre_tanh - _softplus(-2.0 * pre_tanh))
    lp = normal_lp - ladj                # (A, bb) f32

    # Log-prob: XLU sublane reduce -> (1, bb), already lane-dense.
    logp_ref[...] = jnp.sum(lp, axis=0, keepdims=True)
    # Actions: (A, bb) slab, full-width unmasked stores.
    act_ref[...] = (max_action * action).astype(act_ref.dtype)


def init_policy_params(key, state_dim, action_dim,
                       log_std_multiplier=1.0, log_std_offset=-1.0):
    """PyTorch-default-style init for hidden layers, xavier_uniform(gain=0.01)
    for the final weight.  Final layer stored packed: (HIDDEN, 2*action_dim)."""
    ks = jax.random.split(key, 8)

    def uniform(k, shape, bound):
        return jax.random.uniform(k, shape, jnp.float32, -bound, bound)

    def default_linear(kw, kb, fan_in, fan_out):
        bound = 1.0 / math.sqrt(fan_in)
        return uniform(kw, (fan_in, fan_out), bound), uniform(kb, (1, fan_out), bound)

    w1, b1 = default_linear(ks[0], ks[1], state_dim, HIDDEN)
    w2, b2 = default_linear(ks[2], ks[3], HIDDEN, HIDDEN)
    w3, b3 = default_linear(ks[4], ks[5], HIDDEN, HIDDEN)
    fan_in, fan_out = HIDDEN, 2 * action_dim
    xav_bound = 0.01 * math.sqrt(6.0 / (fan_in + fan_out))
    w4 = uniform(ks[6], (fan_in, fan_out), xav_bound)
    b4 = uniform(ks[7], (1, fan_out), 1.0 / math.sqrt(fan_in))
    return dict(
        w1=w1, b1=b1, w2=w2, b2=b2, w3=w3, b3=b3, w4=w4, b4=b4,
        log_std_multiplier=jnp.float32(log_std_multiplier),
        log_std_offset=jnp.float32(log_std_offset),
    )


def tanh_gaussian_policy_forward(obs, params, eps=None, *, max_action,
                                 deterministic=False, block_b=2048):
    """Returns (max_action * actions [B, A], log_probs [B])."""
    B, S = obs.shape
    A = params["w4"].shape[1] // 2
    bf16 = jnp.bfloat16

    # Batch tile: batch lives in lanes, so bb is a multiple of 128.  Large tiles
    # amortize per-step grid overhead on single-TC v5e/v6e; cap so that the
    # grid has >= 2 steps whenever the padded batch allows (v7x megacore).
    Bp128 = _round_up(B, 128)
    bb = min(block_b, Bp128)
    if Bp128 >= 256:
        bb = min(bb, _round_up((Bp128 + 1) // 2, 128))
    bb = _round_up(bb, 128)
    Bp = _round_up(B, bb)
    n_blocks = Bp // bb

    # Transposed streamed inputs: obs (S, Bp) bf16, eps (A, Bp) f32.
    obs_t = jnp.pad(obs.astype(jnp.float32), ((0, Bp - B), (0, 0))).T.astype(bf16)

    # Fold log_std_multiplier / log_std_offset into the log_std half of w4/b4.
    mult = params["log_std_multiplier"]
    off = params["log_std_offset"]
    ones_a = jnp.ones((A,), jnp.float32)
    scale = jnp.concatenate([ones_a, ones_a * mult])            # (2A,)
    shift = jnp.concatenate([jnp.zeros((A,), jnp.float32), ones_a * off])
    w4_f = params["w4"] * scale[None, :]
    b4_f = params["b4"] * scale[None, :] + shift[None, :]

    # Pre-transposed weights (bf16) and biases ((out, 1) f32) as whole-array,
    # single-buffered VMEM residents.
    w1t = params["w1"].T.astype(bf16)      # (HIDDEN, S)
    w2t = params["w2"].T.astype(bf16)      # (HIDDEN, HIDDEN)
    w3t = params["w3"].T.astype(bf16)      # (HIDDEN, HIDDEN)
    w4t = w4_f.T.astype(bf16)              # (2A, HIDDEN)
    b1t = params["b1"].T                    # (HIDDEN, 1) f32
    b2t = params["b2"].T
    b3t = params["b3"].T
    b4t = b4_f.T                            # (2A, 1) f32

    vmem_spec = functools.partial(pl.BlockSpec, memory_space=pltpu.MemorySpace.VMEM)

    in_specs = [pl.BlockSpec((S, bb), lambda i: (0, i))]        # obs, batch-tiled in lanes
    inputs = [obs_t]
    if not deterministic:
        eps_t = jnp.pad(eps.astype(jnp.float32), ((0, Bp - B), (0, 0))).T  # (A, Bp)
        in_specs.append(pl.BlockSpec((A, bb), lambda i: (0, i)))
        inputs.append(eps_t)
    in_specs += [vmem_spec()] * 8
    inputs += [w1t, b1t, w2t, b2t, w3t, b3t, w4t, b4t]

    flops = 2 * Bp * (S * HIDDEN + 2 * HIDDEN * HIDDEN + HIDDEN * 2 * A)
    bytes_accessed = (
        obs_t.size * 2
        + (0 if deterministic else Bp * A * 4)
        + (w1t.size + w2t.size + w3t.size + w4t.size) * 2
        + (b1t.size + b2t.size + b3t.size + b4t.size) * 4
        + Bp * A * 4 + Bp * 4)
    cost = pl.CostEstimate(flops=int(flops),
                           transcendentals=int(4 * Bp * A),
                           bytes_accessed=int(bytes_accessed))

    kern = functools.partial(_policy_kernel,
                             max_action=float(max_action),
                             deterministic=bool(deterministic))

    act_t, logp_t = pl.pallas_call(
        kern,
        grid=(n_blocks,),
        in_specs=in_specs,
        out_specs=(
            pl.BlockSpec((A, bb), lambda i: (0, i)),    # actions, lane-dense
            pl.BlockSpec((1, bb), lambda i: (0, i)),    # log-prob, lane-dense
        ),
        out_shape=(
            jax.ShapeDtypeStruct((A, Bp), jnp.float32),
            jax.ShapeDtypeStruct((1, Bp), jnp.float32),
        ),
        compiler_params=pltpu.CompilerParams(
            dimension_semantics=("parallel",),
            vmem_limit_bytes=32 * 1024 * 1024,  # footprint is a few MiB even at bb=2048
        ),
        cost_estimate=cost,
    )(*inputs)

    # Wrapper-side un-transpose / slice (layout plumbing only).
    return act_t[:, :B].T, logp_t[0, :B]


def _reference_forward(obs, params, eps, *, max_action, deterministic=False):
    """Pure-JAX reference with the same bf16-matmul / f32-epilogue math."""
    bf16 = jnp.bfloat16
    mm = lambda x, w: jnp.dot(x.astype(bf16), w.astype(bf16),
                              preferred_element_type=jnp.float32)
    h = jnp.maximum(mm(obs, params["w1"]) + params["b1"], 0.0)
    h = jnp.maximum(mm(h, params["w2"]) + params["b2"], 0.0)
    h = jnp.maximum(mm(h, params["w3"]) + params["b3"], 0.0)
    head = mm(h, params["w4"]) + params["b4"]
    A = params["w4"].shape[1] // 2
    mean, log_std = head[:, :A], head[:, A:]
    log_std = params["log_std_multiplier"] * log_std + params["log_std_offset"]
    log_std = jnp.clip(log_std, LOG_STD_MIN, LOG_STD_MAX)
    std = jnp.exp(log_std)
    if deterministic:
        pre_tanh = mean
        normal_lp = -log_std - _HALF_LOG_2PI
    else:
        pre_tanh = mean + std * eps
        normal_lp = -0.5 * eps * eps - log_std - _HALF_LOG_2PI
    action = jnp.tanh(pre_tanh)
    ladj = 2.0 * (_LOG2 - pre_tanh - jax.nn.softplus(-2.0 * pre_tanh))
    lp = jnp.sum(normal_lp - ladj, axis=-1)
    return max_action * action, lp


if __name__ == "__main__":
    B, STATE_DIM, ACTION_DIM = 2, 16, 8
    MAX_ACTION = 1.0

    key = jax.random.PRNGKey(0)
    k_params, k_obs, k_eps = jax.random.split(key, 3)

    params = init_policy_params(k_params, STATE_DIM, ACTION_DIM,
                                log_std_multiplier=1.0, log_std_offset=-1.0)
    obs = jax.random.normal(k_obs, (B, STATE_DIM), jnp.float32)
    eps = jax.random.normal(k_eps, (B, ACTION_DIM), jnp.float32)

    # stochastic (rsample) forward
    actions, log_probs = tanh_gaussian_policy_forward(
        obs, params, eps, max_action=MAX_ACTION, deterministic=False)
    actions = jax.block_until_ready(actions)
    log_probs = jax.block_until_ready(log_probs)

    # deterministic forward (action = tanh(mean)); no eps input needed
    actions_d, log_probs_d = tanh_gaussian_policy_forward(
        obs, params, max_action=MAX_ACTION, deterministic=True)
    actions_d = jax.block_until_ready(actions_d)
    log_probs_d = jax.block_until_ready(log_probs_d)

    # sanity checks against the pure-JAX reference (same bf16-matmul math)
    ref_a, ref_lp = _reference_forward(obs, params, eps,
                                       max_action=MAX_ACTION, deterministic=False)
    ref_ad, ref_lpd = _reference_forward(obs, params, eps,
                                         max_action=MAX_ACTION, deterministic=True)
    assert actions.shape == (B, ACTION_DIM) and log_probs.shape == (B,)
    assert jnp.allclose(actions, ref_a, atol=2e-3, rtol=2e-3)
    assert jnp.allclose(log_probs, ref_lp, atol=5e-3, rtol=5e-3)
    assert jnp.allclose(actions_d, ref_ad, atol=2e-3, rtol=2e-3)
    assert jnp.allclose(log_probs_d, ref_lpd, atol=5e-3, rtol=5e-3)

    print("KERNEL_OK")
</pallas_src>

<mosaic_0001>
module attributes {stable_mosaic.version = 11 : i64} {
  func.func @_policy_kernel(%arg0: i32, %arg1: memref<16x128xbf16, #tpu.memory_space<vmem>>, %arg2: memref<8x128xf32, #tpu.memory_space<vmem>>, %arg3: memref<256x16xbf16, #tpu.memory_space<vmem>>, %arg4: memref<256x1xf32, #tpu.memory_space<vmem>>, %arg5: memref<256x256xbf16, #tpu.memory_space<vmem>>, %arg6: memref<256x1xf32, #tpu.memory_space<vmem>>, %arg7: memref<256x256xbf16, #tpu.memory_space<vmem>>, %arg8: memref<256x1xf32, #tpu.memory_space<vmem>>, %arg9: memref<16x256xbf16, #tpu.memory_space<vmem>>, %arg10: memref<16x1xf32, #tpu.memory_space<vmem>>, %arg11: memref<8x128xf32, #tpu.memory_space<vmem>>, %arg12: memref<1x128xf32, #tpu.memory_space<vmem>>) attributes {dimension_semantics = [#tpu.dimension_semantics<parallel>], iteration_bounds = array<i64: 1>, scalar_prefetch = 0 : i64, scratch_operands = 0 : i64, tpu.core_type = #tpu.core_type<tc>, window_params = [{transform_indices = @transform_0, window_bounds = array<i64: 16, 128>}, {transform_indices = @transform_1, window_bounds = array<i64: 8, 128>}, {pipeline_mode = #tpu.pipeline_mode<synchronous>, transform_indices = @transform_2, window_bounds = array<i64: 256, 16>}, {pipeline_mode = #tpu.pipeline_mode<synchronous>, transform_indices = @transform_3, window_bounds = array<i64: 256, 1>}, {pipeline_mode = #tpu.pipeline_mode<synchronous>, transform_indices = @transform_4, window_bounds = array<i64: 256, 256>}, {pipeline_mode = #tpu.pipeline_mode<synchronous>, transform_indices = @transform_5, window_bounds = array<i64: 256, 1>}, {pipeline_mode = #tpu.pipeline_mode<synchronous>, transform_indices = @transform_6, window_bounds = array<i64: 256, 256>}, {pipeline_mode = #tpu.pipeline_mode<synchronous>, transform_indices = @transform_7, window_bounds = array<i64: 256, 1>}, {pipeline_mode = #tpu.pipeline_mode<synchronous>, transform_indices = @transform_8, window_bounds = array<i64: 16, 256>}, {pipeline_mode = #tpu.pipeline_mode<synchronous>, transform_indices = @transform_9, window_bounds = array<i64: 16, 1>}, {transform_indices = @transform_10, window_bounds = array<i64: 8, 128>}, {transform_indices = @transform_11, window_bounds = array<i64: 1, 128>}]} {
    %c0 = arith.constant 0 : index
    %c0_0 = arith.constant 0 : index
    %0 = vector.load %arg1[%c0, %c0_0] : memref<16x128xbf16, #tpu.memory_space<vmem>>, vector<16x128xbf16>
    %c0_1 = arith.constant 0 : index
    %c0_2 = arith.constant 0 : index
    %1 = vector.load %arg3[%c0_1, %c0_2] : memref<256x16xbf16, #tpu.memory_space<vmem>>, vector<256x16xbf16>
    %cst = arith.constant dense<0.000000e+00> : vector<256x128xf32>
    %2 = tpu.matmul %1, %0, %cst {dimension_numbers = #tpu.dot_dimension_numbers<[1], [0], [0], [1], [0, 0, 1, 1], [], []>} : vector<256x16xbf16>, vector<16x128xbf16>, vector<256x128xf32> -> vector<256x128xf32>
    %c0_3 = arith.constant 0 : index
    %c0_4 = arith.constant 0 : index
    %3 = vector.load %arg4[%c0_3, %c0_4] : memref<256x1xf32, #tpu.memory_space<vmem>>, vector<256x1xf32>
    %4 = vector.broadcast %3 : vector<256x1xf32> to vector<256x128xf32>
    %5 = arith.addf %2, %4 : vector<256x128xf32>
    %cst_5 = arith.constant 0.000000e+00 : f32
    %6 = vector.broadcast %cst_5 : f32 to vector<256x128xf32>
    %7 = arith.maximumf %5, %6 : vector<256x128xf32>
    %c0_6 = arith.constant 0 : index
    %c0_7 = arith.constant 0 : index
    %8 = vector.load %arg5[%c0_6, %c0_7] : memref<256x256xbf16, #tpu.memory_space<vmem>>, vector<256x256xbf16>
    %9 = arith.truncf %7 : vector<256x128xf32> to vector<256x128xbf16>
    %cst_8 = arith.constant dense<0.000000e+00> : vector<256x128xf32>
    %10 = tpu.matmul %8, %9, %cst_8 {dimension_numbers = #tpu.dot_dimension_numbers<[1], [0], [0], [1], [0, 0, 1, 1], [], []>} : vector<256x256xbf16>, vector<256x128xbf16>, vector<256x128xf32> -> vector<256x128xf32>
    %c0_9 = arith.constant 0 : index
    %c0_10 = arith.constant 0 : index
    %11 = vector.load %arg6[%c0_9, %c0_10] : memref<256x1xf32, #tpu.memory_space<vmem>>, vector<256x1xf32>
    %12 = vector.broadcast %11 : vector<256x1xf32> to vector<256x128xf32>
    %13 = arith.addf %10, %12 : vector<256x128xf32>
    %cst_11 = arith.constant 0.000000e+00 : f32
    %14 = vector.broadcast %cst_11 : f32 to vector<256x128xf32>
    %15 = arith.maximumf %13, %14 : vector<256x128xf32>
    %c0_12 = arith.constant 0 : index
    %c0_13 = arith.constant 0 : index
    %16 = vector.load %arg7[%c0_12, %c0_13] : memref<256x256xbf16, #tpu.memory_space<vmem>>, vector<256x256xbf16>
    %17 = arith.truncf %15 : vector<256x128xf32> to vector<256x128xbf16>
    %cst_14 = arith.constant dense<0.000000e+00> : vector<256x128xf32>
    %18 = tpu.matmul %16, %17, %cst_14 {dimension_numbers = #tpu.dot_dimension_numbers<[1], [0], [0], [1], [0, 0, 1, 1], [], []>} : vector<256x256xbf16>, vector<256x128xbf16>, vector<256x128xf32> -> vector<256x128xf32>
    %c0_15 = arith.constant 0 : index
    %c0_16 = arith.constant 0 : index
    %19 = vector.load %arg8[%c0_15, %c0_16] : memref<256x1xf32, #tpu.memory_space<vmem>>, vector<256x1xf32>
    %20 = vector.broadcast %19 : vector<256x1xf32> to vector<256x128xf32>
    %21 = arith.addf %18, %20 : vector<256x128xf32>
    %cst_17 = arith.constant 0.000000e+00 : f32
    %22 = vector.broadcast %cst_17 : f32 to vector<256x128xf32>
    %23 = arith.maximumf %21, %22 : vector<256x128xf32>
    %c0_18 = arith.constant 0 : index
    %c0_19 = arith.constant 0 : index
    %24 = vector.load %arg9[%c0_18, %c0_19] : memref<16x256xbf16, #tpu.memory_space<vmem>>, vector<16x256xbf16>
    %25 = arith.truncf %23 : vector<256x128xf32> to vector<256x128xbf16>
    %cst_20 = arith.constant dense<0.000000e+00> : vector<16x128xf32>
    %26 = tpu.matmul %24, %25, %cst_20 {dimension_numbers = #tpu.dot_dimension_numbers<[1], [0], [0], [1], [0, 0, 1, 1], [], []>} : vector<16x256xbf16>, vector<256x128xbf16>, vector<16x128xf32> -> vector<16x128xf32>
    %c0_21 = arith.constant 0 : index
    %c0_22 = arith.constant 0 : index
    %27 = vector.load %arg10[%c0_21, %c0_22] : memref<16x1xf32, #tpu.memory_space<vmem>>, vector<16x1xf32>
    %28 = vector.broadcast %27 : vector<16x1xf32> to vector<16x128xf32>
    %29 = arith.addf %26, %28 : vector<16x128xf32>
    %30 = vector.extract_strided_slice %29 {offsets = [0, 0], sizes = [8, 128], strides = [1, 1]} : vector<16x128xf32> to vector<8x128xf32>
    %31 = vector.extract_strided_slice %29 {offsets = [8, 0], sizes = [8, 128], strides = [1, 1]} : vector<16x128xf32> to vector<8x128xf32>
    %cst_23 = arith.constant -2.000000e+01 : f32
    %cst_24 = arith.constant 2.000000e+00 : f32
    %32 = vector.broadcast %cst_23 : f32 to vector<8x128xf32>
    %33 = arith.maximumf %32, %31 : vector<8x128xf32>
    %34 = vector.broadcast %cst_24 : f32 to vector<8x128xf32>
    %35 = arith.minimumf %34, %33 : vector<8x128xf32>
    %36 = math.exp %35 : vector<8x128xf32>
    %c0_25 = arith.constant 0 : index
    %c0_26 = arith.constant 0 : index
    %37 = vector.load %arg2[%c0_25, %c0_26] : memref<8x128xf32, #tpu.memory_space<vmem>>, vector<8x128xf32>
    %38 = arith.mulf %36, %37 : vector<8x128xf32>
    %39 = arith.addf %30, %38 : vector<8x128xf32>
    %40 = arith.mulf %37, %37 : vector<8x128xf32>
    %cst_27 = arith.constant -5.000000e-01 : f32
    %41 = vector.broadcast %cst_27 : f32 to vector<8x128xf32>
    %42 = arith.mulf %41, %40 : vector<8x128xf32>
    %43 = arith.subf %42, %35 : vector<8x128xf32>
    %cst_28 = arith.constant 0.918938517 : f32
    %44 = vector.broadcast %cst_28 : f32 to vector<8x128xf32>
    %45 = arith.subf %43, %44 : vector<8x128xf32>
    %46 = math.tanh %39 : vector<8x128xf32>
    %cst_29 = arith.constant 0.693147182 : f32
    %47 = vector.broadcast %cst_29 : f32 to vector<8x128xf32>
    %48 = arith.subf %47, %39 : vector<8x128xf32>
    %cst_30 = arith.constant -2.000000e+00 : f32
    %49 = vector.broadcast %cst_30 : f32 to vector<8x128xf32>
    %50 = arith.mulf %49, %39 : vector<8x128xf32>
    %cst_31 = arith.constant 0.000000e+00 : f32
    %51 = vector.broadcast %cst_31 : f32 to vector<8x128xf32>
    %52 = arith.maximumf %50, %51 : vector<8x128xf32>
    %53 = math.absf %50 : vector<8x128xf32>
    %cst_32 = arith.constant 0.000000e+00 : f32
    %54 = vector.broadcast %cst_32 : f32 to vector<8x128xf32>
    %55 = arith.subf %54, %53 : vector<8x128xf32>
    %56 = math.exp %55 : vector<8x128xf32>
    %cst_33 = arith.constant 1.000000e+00 : f32
    %57 = vector.broadcast %cst_33 : f32 to vector<8x128xf32>
    %58 = arith.addf %57, %56 : vector<8x128xf32>
    %59 = math.log %58 : vector<8x128xf32>
    %60 = arith.addf %52, %59 : vector<8x128xf32>
    %61 = arith.subf %48, %60 : vector<8x128xf32>
    %cst_34 = arith.constant 2.000000e+00 : f32
    %62 = vector.broadcast %cst_34 : f32 to vector<8x128xf32>
    %63 = arith.mulf %62, %61 : vector<8x128xf32>
    %64 = arith.subf %45, %63 : vector<8x128xf32>
    %cst_35 = arith.constant dense<0.000000e+00> : vector<128xf32>
    %65 = vector.multi_reduction <add>, %64, %cst_35 [0] : vector<8x128xf32> to vector<128xf32>
    %66 = vector.shape_cast %65 : vector<128xf32> to vector<1x128xf32>
    %c0_36 = arith.constant 0 : index
    %c0_37 = arith.constant 0 : index
    %67 = vector.load %arg12[%c0_36, %c0_37] : memref<1x128xf32, #tpu.memory_space<vmem>>, vector<1x128xf32>
    tpu.vector_store %arg12[%c0_36, %c0_37], %66 {strides = array<i32>} : memref<1x128xf32, #tpu.memory_space<vmem>>, vector<1x128xf32>,
    %cst_38 = arith.constant 1.000000e+00 : f32
    %68 = vector.broadcast %cst_38 : f32 to vector<8x128xf32>
    %69 = arith.mulf %68, %46 : vector<8x128xf32>
    %c0_39 = arith.constant 0 : index
    %c0_40 = arith.constant 0 : index
    %70 = vector.load %arg11[%c0_39, %c0_40] : memref<8x128xf32, #tpu.memory_space<vmem>>, vector<8x128xf32>
    tpu.vector_store %arg11[%c0_39, %c0_40], %69 {strides = array<i32>} : memref<8x128xf32, #tpu.memory_space<vmem>>, vector<8x128xf32>,
    return
  }
  func.func @transform_0(%arg0: i32) -> (i32, i32) {
    %c0_i32 = arith.constant 0 : i32
    %c0_i32_0 = arith.constant 0 : i32
    return %c0_i32, %arg0 : i32, i32
  }
  func.func @transform_1(%arg0: i32) -> (i32, i32) {
    %c0_i32 = arith.constant 0 : i32
    %c0_i32_0 = arith.constant 0 : i32
    return %c0_i32, %arg0 : i32, i32
  }
  func.func @transform_2(%arg0: i32) -> (i32, i32) {
    %c0_i32 = arith.constant 0 : i32
    %c0_i32_0 = arith.constant 0 : i32
    %c0_i32_1 = arith.constant 0 : i32
    return %c0_i32, %c0_i32_0 : i32, i32
  }
  func.func @transform_3(%arg0: i32) -> (i32, i32) {
    %c0_i32 = arith.constant 0 : i32
    %c0_i32_0 = arith.constant 0 : i32
    %c0_i32_1 = arith.constant 0 : i32
    return %c0_i32, %c0_i32_0 : i32, i32
  }
  func.func @transform_4(%arg0: i32) -> (i32, i32) {
    %c0_i32 = arith.constant 0 : i32
    %c0_i32_0 = arith.constant 0 : i32
    %c0_i32_1 = arith.constant 0 : i32
    return %c0_i32, %c0_i32_0 : i32, i32
  }
  func.func @transform_5(%arg0: i32) -> (i32, i32) {
    %c0_i32 = arith.constant 0 : i32
    %c0_i32_0 = arith.constant 0 : i32
    %c0_i32_1 = arith.constant 0 : i32
    return %c0_i32, %c0_i32_0 : i32, i32
  }
  func.func @transform_6(%arg0: i32) -> (i32, i32) {
    %c0_i32 = arith.constant 0 : i32
    %c0_i32_0 = arith.constant 0 : i32
    %c0_i32_1 = arith.constant 0 : i32
    return %c0_i32, %c0_i32_0 : i32, i32
  }
  func.func @transform_7(%arg0: i32) -> (i32, i32) {
    %c0_i32 = arith.constant 0 : i32
    %c0_i32_0 = arith.constant 0 : i32
    %c0_i32_1 = arith.constant 0 : i32
    return %c0_i32, %c0_i32_0 : i32, i32
  }
  func.func @transform_8(%arg0: i32) -> (i32, i32) {
    %c0_i32 = arith.constant 0 : i32
    %c0_i32_0 = arith.constant 0 : i32
    %c0_i32_1 = arith.constant 0 : i32
    return %c0_i32, %c0_i32_0 : i32, i32
  }
  func.func @transform_9(%arg0: i32) -> (i32, i32) {
    %c0_i32 = arith.constant 0 : i32
    %c0_i32_0 = arith.constant 0 : i32
    %c0_i32_1 = arith.constant 0 : i32
    return %c0_i32, %c0_i32_0 : i32, i32
  }
  func.func @transform_10(%arg0: i32) -> (i32, i32) {
    %c0_i32 = arith.constant 0 : i32
    %c0_i32_0 = arith.constant 0 : i32
    return %c0_i32, %arg0 : i32, i32
  }
  func.func @transform_11(%arg0: i32) -> (i32, i32) {
    %c0_i32 = arith.constant 0 : i32
    %c0_i32_0 = arith.constant 0 : i32
    return %c0_i32, %arg0 : i32, i32
  }
}

</mosaic_0001>

<bundles_post_ra>
// kernel: tpu_custom_call.1
= control target key start
LH: loop header
LB: loop body
LE: loop exit
PB: predicated region body
PF: predicated region fallthrough
CT: control target
= control target key end

     0   :  { %17 = vsyncpa [#allocation3], 0  ;;  %v2377_v3 = vmov 0   ;;  %vm352_vm0 = vcmask 130048   ;;  %s3518_s0 = inlined_call_operand.vmem [shape: bf16[16,128], index: 0, kind: input, shape index: {}]   ;;  %s3519_s1 = inlined_call_operand.vmem [shape: f32[8,128], index: 1, kind: input, shape index: {}]   ;;  %s3520_s2 = inlined_call_operand.vmem [shape: bf16[256,16], index: 2, kind: input, shape index: {}]   ;;  %s3521_s3 = inlined_call_operand.vmem [shape: f32[256,1], index: 3, kind: input, shape index: {}]   ;;  %s3522_s4 = inlined_call_operand.vmem [shape: bf16[256,256], index: 4, kind: input, shape index: {}]   ;;  %s3523_s5 = inlined_call_operand.vmem [shape: f32[256,1], index: 5, kind: input, shape index: {}]   ;;  %s3524_s6 = inlined_call_operand.vmem [shape: bf16[256,256], index: 6, kind: input, shape index: {}]   ;;  %s3525_s7 = inlined_call_operand.vmem [shape: f32[256,1], index: 7, kind: input, shape index: {}]   ;;  %s3526_s8 = inlined_call_operand.vmem [shape: bf16[16,256], index: 8, kind: input, shape index: {}]   ;;  %s3527_s9 = inlined_call_operand.vmem [shape: f32[16,1], index: 9, kind: input, shape index: {}]   ;;  %s3528_s10 = inlined_call_operand.hbm [shape: f32[8,128], index: 10, kind: output, shape index: {0}]   ;;  %s3529_s11 = inlined_call_operand.hbm [shape: f32[1,128], index: 11, kind: output, shape index: {1}]  }
   0x1   :  { %v104_v0 = vld [vmem:[%s3521_s3 + $0xf0] sm:$0xff]  ;;  %v102_v1 = vld [vmem:[%s3521_s3 + $0xe0] sm:$0xff]  ;;  %2316 = vset.pattern.permute.xlu2 %v2377_v3  ;;  %2315 = vset.pattern.permute.xlu1 %v2377_v3  ;;  %v2233_v6 = vld [vmem:[%s3520_s2 + $0x38] sm:$0xff] }
   0x2   :  { %v88_v2 = vld [vmem:[%s3521_s3 + $0x70] sm:$0xff]  ;;  %v2225_v4 = vld [vmem:[%s3518_s0] sm:$0xff]  ;;  %2314 = vset.pattern.permute.xlu0 %v2377_v3  ;;  %248 = vperm.xlu2 %2316, %v102_v1   ;;  %v2237_v7 = vld [vmem:[%s3520_s2 + $0x58] sm:$0xff] }
   0x3   :  { %258 = vperm.xlu0 %2314, %v104_v0   ;;  %178 = vperm.xlu1 %2315, %v88_v2   ;;  %v2226_v5 = vld [vmem:[%s3520_s2] sm:$0xff]  ;;  %v2231_v8 = vld [vmem:[%s3520_s2 + $0x28] sm:$0xff]  ;;  %v105_v10 = vld [vmem:[%s3521_s3 + $0xf8] sm:$0xff] }
   0x4   :  { %408 = vmatpush.bf16.msra.mxu0 %v2225_v4  ;;  %2309 = vmatpush.bf16.msra.mxu2 %v2225_v4  ;;  %v103_v9 = vld [vmem:[%s3521_s3 + $0xe8] sm:$0xff]  ;;  %v89_v11 = vld [vmem:[%s3521_s3 + $0x78] sm:$0xff] }
   0x5   :  { %2310 = vmatpush.bf16.msra.mxu3 %v2225_v4  ;;  %2308 = vmatpush.bf16.msra.mxu1 %v2225_v4 }
   0x7   :  { %1944 = vmatmul.msk.bf16.vlgmr.msra.gmra.mxu0 %vm352_vm0, %v2226_v5  ;;  %1951 = vmatmul.msk.bf16.vlgmr.msra.gmra.mxu2 %vm352_vm0, %v2233_v6 }
   0x8   :  { %1955 = vmatmul.msk.bf16.vlgmr.msra.gmra.mxu3 %vm352_vm0, %v2237_v7  ;;  %1949 = vmatmul.msk.bf16.vlgmr.msra.gmra.mxu1 %vm352_vm0, %v2231_v8 }
   0x9   :  { %18 = vsyncpa [#allocation5], 0  ;;  %v100_v12 = vld [vmem:[%s3521_s3 + $0xd0] sm:$0xff]  ;;  %v87_v13 = vld [vmem:[%s3521_s3 + $0x68] sm:$0xff]  ;;  %s2378_s19 = smov [#allocation2]   ;;  %s1851_s22 = sshll.u32 %s3528_s10, 4  ;;  %s1852_s22 = int_to_ptr.hbm [resolvable:$true] %s1851_s22 }
   0xa   :  { %253 = vperm.xlu2 %2316, %v103_v9   ;;  %v86_v14 = vld [vmem:[%s3521_s3 + $0x60] sm:$0xff]  ;;  %v2227_v15 = vld [vmem:[%s3520_s2 + $0x8] sm:$0xff]  ;;  %v2232_v18 = vld [vmem:[%s3520_s2 + $0x30] sm:$0xff]  ;;  %s1862_s24 = sshll.u32 %s3529_s11, 4  ;;  %s1863_s24 = int_to_ptr.hbm [resolvable:$true] %s1862_s24 }
   0xb   :  { %263 = vperm.xlu0 %2314, %v105_v10   ;;  %183 = vperm.xlu1 %2315, %v89_v11   ;;  %v2234_v16 = vld [vmem:[%s3520_s2 + $0x40] sm:$0xff]  ;;  %v85_v19 = vld [vmem:[%s3521_s3 + $0x58] sm:$0xff]  ;;  %v84_v21 = vld [vmem:[%s3521_s3 + $0x50] sm:$0xff] }
   0xc   :  { %v2238_v17 = vld [vmem:[%s3520_s2 + $0x60] sm:$0xff]  ;;  %v101_v20 = vld [vmem:[%s3521_s3 + $0xd8] sm:$0xff]  ;;  %v99_v24 = vld [vmem:[%s3521_s3 + $0xc8] sm:$0xff] }
   0xd   :  { %v82_v22 = vld [vmem:[%s3521_s3 + $0x40] sm:$0xff]  ;;  %v2228_v25 = vld [vmem:[%s3520_s2 + $0x10] sm:$0xff]  ;;  %v2235_v26 = vld [vmem:[%s3520_s2 + $0x48] sm:$0xff] }
   0xe   :  { %v98_v23 = vld [vmem:[%s3521_s3 + $0xc0] sm:$0xff]  ;;  %v2239_v27 = vld [vmem:[%s3520_s2 + $0x68] sm:$0xff]  ;;  %v97_v28 = vld [vmem:[%s3521_s3 + $0xb8] sm:$0xff] }
   0xf   :  { %v96_v29 = vld [vmem:[%s3521_s3 + $0xb0] sm:$0xff]  ;;  %v83_v30 = vld [vmem:[%s3521_s3 + $0x48] sm:$0xff]  ;;  %v94_v31 = vld [vmem:[%s3521_s3 + $0xa0] sm:$0xff] }
  0x10   :  { %v81_v32 = vld [vmem:[%s3521_s3 + $0x38] sm:$0xff]  ;;  %v80_v33 = vld [vmem:[%s3521_s3 + $0x30] sm:$0xff]  ;;  %v79_v37 = vld [vmem:[%s3521_s3 + $0x28] sm:$0xff] }
  0x11   :  { %v2229_v34 = vld [vmem:[%s3520_s2 + $0x18] sm:$0xff]  ;;  %v2236_v35 = vld [vmem:[%s3520_s2 + $0x50] sm:$0xff]  ;;  %v95_v38 = vld [vmem:[%s3521_s3 + $0xa8] sm:$0xff] }
  0x12   :  { %238 = vperm.xlu2 %2316, %v100_v12   ;;  %v2240_v36 = vld [vmem:[%s3520_s2 + $0x70] sm:$0xff]  ;;  %v78_v39 = vld [vmem:[%s3521_s3 + $0x20] sm:$0xff]  ;;  %v93_v42 = vld [vmem:[%s3521_s3 + $0x98] sm:$0xff] }
  0x13   :  { %173 = vperm.xlu1 %2315, %v87_v13   ;;  %168 = vperm.xlu0 %2314, %v86_v14   ;;  %v76_v40 = vld [vmem:[%s3521_s3 + $0x10] sm:$0xff]  ;;  %v2230_v43 = vld [vmem:[%s3520_s2 + $0x20] sm:$0xff]  ;;  %v2241_v44 = vld [vmem:[%s3520_s2 + $0x78] sm:$0xff] }
  0x14   :  { %v92_v41 = vld [vmem:[%s3521_s3 + $0x90] sm:$0xff]  ;;  %v91_v45 = vld [vmem:[%s3521_s3 + $0x88] sm:$0xff]  ;;  %v90_v46 = vld [vmem:[%s3521_s3 + $0x80] sm:$0xff] }
  0x15   :  { %v77_v47 = vld [vmem:[%s3521_s3 + $0x18] sm:$0xff]  ;;  %v584_v48 = vld [vmem:[%s3523_s5 + $0x70] sm:$0xff]  ;;  %v75_v49 = vld [vmem:[%s3521_s3 + $0x8] sm:$0xff] }
  0x16   :  { %v74_v50 = vld [vmem:[%s3521_s3] sm:$0xff]  ;;  %v583_v51 = vld [vmem:[%s3523_s5 + $0x68] sm:$0xff]  ;;  %v585_v53 = vld [vmem:[%s3523_s5 + $0x78] sm:$0xff] }
  0x17   :  { %1945 = vmatmul.msk.bf16.gmra.mxu0 %vm352_vm0, %v2227_v15  ;;  %1952 = vmatmul.msk.bf16.gmra.mxu2 %vm352_vm0, %v2234_v16  ;;  %v582_v52 = vld [vmem:[%s3523_s5 + $0x60] sm:$0xff]  ;;  %v600_v54 = vld [vmem:[%s3523_s5 + $0xf0] sm:$0xff]  ;;  %v581_v55 = vld [vmem:[%s3523_s5 + $0x58] sm:$0xff] }
  0x18   :  { %1956 = vmatmul.msk.bf16.gmra.mxu3 %vm352_vm0, %v2238_v17  ;;  %1950 = vmatmul.msk.bf16.gmra.mxu1 %vm352_vm0, %v2232_v18  ;;  %v580_v56 = vld [vmem:[%s3523_s5 + $0x50] sm:$0xff]  ;;  %v579_v57 = vld [vmem:[%s3523_s5 + $0x48] sm:$0xff]  ;;  %v578_v58 = vld [vmem:[%s3523_s5 + $0x40] sm:$0xff] }
  0x19   :  { %v601_v59 = vld [vmem:[%s3523_s5 + $0xf8] sm:$0xff]  ;;  %v576_v60 = vld [vmem:[%s3523_s5 + $0x30] sm:$0xff]  ;;  %v599_v61 = vld [vmem:[%s3523_s5 + $0xe8] sm:$0xff] }
  0x1a   :  { %163 = vperm.xlu2 %2316, %v85_v19   ;;  %v598_v62 = vld [vmem:[%s3523_s5 + $0xe0] sm:$0xff]  ;;  %v597_v1 = vld [vmem:[%s3523_s5 + $0xd8] sm:$0xff]  ;;  %v596_v2 = vld [vmem:[%s3523_s5 + $0xd0] sm:$0xff] }
  0x1b   :  { %243 = vperm.xlu0 %2314, %v101_v20   ;;  %158 = vperm.xlu1 %2315, %v84_v21   ;;  %v577_v3 = vld [vmem:[%s3523_s5 + $0x38] sm:$0xff]  ;;  %v594_v7 = vld [vmem:[%s3523_s5 + $0xc0] sm:$0xff]  ;;  %v575_v8 = vld [vmem:[%s3523_s5 + $0x28] sm:$0xff] }
  0x1c   :  { %v574_v9 = vld [vmem:[%s3523_s5 + $0x20] sm:$0xff]  ;;  %v573_v14 = vld [vmem:[%s3523_s5 + $0x18] sm:$0xff]  ;;  %v572_v16 = vld [vmem:[%s3523_s5 + $0x10] sm:$0xff] }
  0x1d   :  { %v595_v17 = vld [vmem:[%s3523_s5 + $0xc8] sm:$0xff] }
  0x22   :  { %148 = vperm.xlu2 %2316, %v82_v22  }
  0x23   :  { %228 = vperm.xlu0 %2314, %v98_v23   ;;  %233 = vperm.xlu1 %2315, %v99_v24   ;;  %v570_v23 = vld [vmem:[%s3523_s5] sm:$0xff] }
  0x27   :  { %1946 = vmatmul.msk.bf16.gmra.mxu0 %vm352_vm0, %v2228_v25  ;;  %1953 = vmatmul.msk.bf16.gmra.mxu2 %vm352_vm0, %v2235_v26  ;;  %v593_v25 = vld [vmem:[%s3523_s5 + $0xb8] sm:$0xff]  ;;  %v592_v26 = vld [vmem:[%s3523_s5 + $0xb0] sm:$0xff] }
  0x28   :  { %1957 = vmatmul.msk.bf16.gmra.mxu3 %vm352_vm0, %v2239_v27 }
  0x2a   :  { %223 = vperm.xlu2 %2316, %v97_v28  }
  0x2b   :  { %218 = vperm.xlu1 %2315, %v96_v29   ;;  %153 = vperm.xlu0 %2314, %v83_v30  }
  0x32   :  { %208 = vperm.xlu2 %2316, %v94_v31  }
  0x33   :  { %143 = vperm.xlu1 %2315, %v81_v32   ;;  %138 = vperm.xlu0 %2314, %v80_v33  }
  0x37   :  { %1947 = vmatmul.msk.bf16.gmra.mxu0 %vm352_vm0, %v2229_v34  ;;  %1954 = vmatmul.msk.bf16.gmra.mxu2 %vm352_vm0, %v2236_v35 }
  0x38   :  { %1958 = vmatmul.msk.bf16.gmra.mxu3 %vm352_vm0, %v2240_v36  ;;  %v591_v36 = vld [vmem:[%s3523_s5 + $0xa8] sm:$0xff] }
  0x3a   :  { %133 = vperm.xlu2 %2316, %v79_v37  }
  0x3b   :  { %213 = vperm.xlu0 %2314, %v95_v38   ;;  %128 = vperm.xlu1 %2315, %v78_v39   ;;  %v590_v38 = vld [vmem:[%s3523_s5 + $0xa0] sm:$0xff]  ;;  %v571_v39 = vld [vmem:[%s3523_s5 + $0x8] sm:$0xff] }
  0x42   :  { %118 = vperm.xlu2 %2316, %v76_v40  }
  0x43   :  { %198 = vperm.xlu0 %2314, %v92_v41   ;;  %203 = vperm.xlu1 %2315, %v93_v42  }
  0x47   :  { %1948 = vmatmul.msk.bf16.gmra.mxu0 %vm352_vm0, %v2230_v43 }
  0x48   :  { %1959 = vmatmul.msk.bf16.gmra.mxu3 %vm352_vm0, %v2241_v44 }
  0x4a   :  { %193 = vperm.xlu2 %2316, %v91_v45  }
  0x4b   :  { %188 = vperm.xlu1 %2315, %v90_v46   ;;  %123 = vperm.xlu0 %2314, %v77_v47  }
  0x52   :  { %674 = vperm.xlu2 %2316, %v584_v48  }
  0x53   :  { %113 = vperm.xlu1 %2315, %v75_v49   ;;  %108 = vperm.xlu0 %2314, %v74_v50  }
  0x5a   :  { %669 = vperm.xlu2 %2316, %v583_v51   ;;  %v586_v51 = vld [vmem:[%s3523_s5 + $0x80] sm:$0xff] }
  0x5b   :  { %664 = vperm.xlu1 %2315, %v582_v52   ;;  %679 = vperm.xlu0 %2314, %v585_v53   ;;  %v589_v52 = vld [vmem:[%s3523_s5 + $0x98] sm:$0xff]  ;;  %v588_v53 = vld [vmem:[%s3523_s5 + $0x90] sm:$0xff] }
  0x5c   :  { %v2655_v6 = vpop.permute.xlu2 %248 }
  0x62   :  { %754 = vperm.xlu2 %2316, %v600_v54  }
  0x63   :  { %659 = vperm.xlu1 %2315, %v581_v55   ;;  %654 = vperm.xlu0 %2314, %v580_v56  }
  0x64   :  { %v2671_v15 = vpop.permute.xlu2 %253 }
  0x6a   :  { %649 = vperm.xlu2 %2316, %v579_v57  }
  0x6b   :  { %644 = vperm.xlu1 %2315, %v578_v58   ;;  %759 = vperm.xlu0 %2314, %v601_v59  }
  0x6c   :  { %v2694_v28 = vpop.permute.xlu2 %238 }
  0x72   :  { %634 = vperm.xlu2 %2316, %v576_v60  }
  0x73   :  { %749 = vperm.xlu1 %2315, %v599_v61   ;;  %744 = vperm.xlu0 %2314, %v598_v62  }
  0x74   :  { %v164_v44 = vpop.permute.xlu2 %163 }
  0x75   :  { %v2642_v63 = vpop.permute.xlu0 %258  ;;  %v179_v0 = vpop.permute.xlu1 %178 }
  0x7a   :  { %739 = vperm.xlu2 %2316, %v597_v1   ;;  %v1210_v1 = vld [vmem:[%s3525_s7 + $0xf0] sm:$0xff] }
  0x7b   :  { %734 = vperm.xlu1 %2315, %v596_v2   ;;  %639 = vperm.xlu0 %2314, %v577_v3   ;;  %v587_v2 = vld [vmem:[%s3523_s5 + $0x88] sm:$0xff]  ;;  %s1849_s5 = sshll.u32 %s2378_s19, 4  ;;  %s1850_s5 = int_to_ptr.vmem [resolvable:$true] %s1849_s5 }
  0x7d   :  { %v2653_v4 = vpop.permute.xlu0 %263  ;;  %v184_v5 = vpop.permute.xlu1 %183 }
  0x82   :  { %724 = vperm.xlu2 %2316, %v594_v7   ;;  %v149_v7 = vpop.permute.xlu2 %148 }
  0x83   :  { %629 = vperm.xlu1 %2315, %v575_v8   ;;  %624 = vperm.xlu0 %2314, %v574_v9  }
  0x84   :  { %v2666_v10 = vpop.f32.mrf.mxu0 }
  0x85   :  { %v169_v11 = vpop.permute.xlu0 %168  ;;  %v435_v12 = vpop.f32.mrf.mxu1 }
  0x86   :  { %v174_v13 = vpop.permute.xlu1 %173 }
  0x8a   :  { %v445_v18 = vpop.f32.mrf.mxu2  ;;  %619 = vperm.xlu2 %2316, %v573_v14   ;;  %v1194_v14 = vld [vmem:[%s3525_s7 + $0x70] sm:$0xff] }
  0x8b   :  { %v2679_v19 = vpop.f32.mrf.mxu3  ;;  %614 = vperm.xlu1 %2315, %v572_v16   ;;  %729 = vperm.xlu0 %2314, %v595_v17   ;;  %v446_v22 = vadd.f32 %v445_v18, %v179_v0  ;;  %v1211_v0 = vld [vmem:[%s3525_s7 + $0xf8] sm:$0xff]  ;;  %v2760_v18 = vpop.permute.xlu2 %223 }
  0x8c   :  { %v2681_v20 = vpop.f32.mrf.mxu0 }
  0x8d   :  { %v437_v21 = vpop.f32.mrf.mxu1  ;;  %v2686_v24 = vpop.permute.xlu0 %243  ;;  %v504_v30 = vmax.f32 %v446_v22, 0.0 }
  0x8e   :  { %v159_v27 = vpop.permute.xlu1 %158  ;;  %v438_v47 = vadd.f32 %v437_v21, %v164_v44  ;;  %v1193_v21 = vld [vmem:[%s3525_s7 + $0x68] sm:$0xff] }
  0x8f   :  { %v436_v46 = vadd.f32 %v435_v12, %v159_v27  ;;  %v1208_v12 = vld [vmem:[%s3525_s7 + $0xe0] sm:$0xff] }
  0x90   :  { %v501_v55 = vmax.f32 %v438_v47, 0.0  ;;  %v1204_v47 = vld [vmem:[%s3525_s7 + $0xc0] sm:$0xff] }
  0x91   :  { %v500_v54 = vmax.f32 %v436_v46, 0.0  ;;  %v1205_v46 = vld [vmem:[%s3525_s7 + $0xc8] sm:$0xff] }
  0x92   :  { %v447_v29 = vpop.f32.mrf.mxu2  ;;  %604 = vperm.xlu2 %2316, %v570_v23  }
  0x93   :  { %v448_v31 = vadd.f32 %v447_v29, %v184_v5  ;;  %v2696_v32 = vpop.f32.mrf.mxu3  ;;  %719 = vperm.xlu1 %2315, %v593_v25   ;;  %714 = vperm.xlu0 %2314, %v592_v26   ;;  %v559_v62 = vpack.c.bf16 %v501_v55, %v500_v54  ;;  %v1192_v25 = vld [vmem:[%s3525_s7 + $0x60] sm:$0xff]  ;;  %v1209_v26 = vld [vmem:[%s3525_s7 + $0xe8] sm:$0xff] }
  0x94   :  { %v2698_v33 = vpop.f32.mrf.mxu0 }
  0x95   :  { %v505_v34 = vmax.f32 %v448_v31, 0.0  ;;  %v440_v35 = vpop.f32.mrf.mxu1  ;;  %v2709_v40 = vpop.permute.xlu0 %228  ;;  %v1190_v31 = vld [vmem:[%s3525_s7 + $0x50] sm:$0xff] }
  0x96   :  { %v2711_v41 = vpop.permute.xlu1 %233  ;;  %v441_v42 = vadd.f32 %v440_v35, %v169_v11  ;;  %v1206_v35 = vld [vmem:[%s3525_s7 + $0xd0] sm:$0xff] }
  0x97   :  { %v561_v37 = vpack.c.bf16 %v505_v34, %v504_v30  ;;  %v1207_v34 = vld [vmem:[%s3525_s7 + $0xd8] sm:$0xff] }
  0x98   :  { %v502_v49 = vmax.f32 %v441_v42, 0.0 }
  0x99   :  { %922 = vmatpush.bf16.msrb.mxu1 %v561_v37 }
  0x9a   :  { %709 = vperm.xlu2 %2316, %v591_v36   ;;  %v2747_v8 = vpop.f32.mrf.mxu2  ;;  %v2784_v36 = vpop.permute.xlu2 %208 }
  0x9b   :  { %v2713_v43 = vpop.f32.mrf.mxu3  ;;  %704 = vperm.xlu1 %2315, %v590_v38   ;;  %609 = vperm.xlu0 %2314, %v571_v39  }
  0x9c   :  { %v2715_v45 = vpop.f32.mrf.mxu0 }
  0x9d   :  { %v442_v48 = vpop.f32.mrf.mxu1  ;;  %v2728_v59 = vpop.permute.xlu0 %153 }
  0x9e   :  { %v443_v50 = vadd.f32 %v442_v48, %v174_v13  ;;  %v2732_v61 = vpop.permute.xlu1 %218  ;;  %v1195_v13 = vld [vmem:[%s3525_s7 + $0x78] sm:$0xff] }
  0x9f   :  { %v1191_v48 = vld [vmem:[%s3525_s7 + $0x58] sm:$0xff] }
  0xa0   :  { %v503_v56 = vmax.f32 %v443_v50, 0.0 }
  0xa2   :  { %684 = vperm.xlu2 %2316, %v586_v51   ;;  %v560_v58 = vpack.c.bf16 %v503_v56, %v502_v49  ;;  %v2765_v22 = vpop.f32.mrf.mxu2  ;;  %v134_v49 = vpop.permute.xlu2 %133 }
  0xa3   :  { %v2726_v57 = vpop.f32.mrf.mxu3  ;;  %699 = vperm.xlu1 %2315, %v589_v52   ;;  %694 = vperm.xlu0 %2314, %v588_v53  }
  0xa4   :  { %v2730_v60 = vpop.f32.mrf.mxu0  ;;  %923 = vmatpush.bf16.msrb.mxu1 %v560_v58 }
  0xa5   :  { %v139_v9 = vpop.permute.xlu0 %138 }
  0xa6   :  { %v144_v11 = vpop.permute.xlu1 %143 }
  0xa8   :  { %924 = vmatpush.bf16.msrb.mxu1 %v559_v62 }
  0xaa   :  { %1369 = vperm.xlu2 %2316, %v1211_v0   ;;  %v2786_v37 = vpop.f32.mrf.mxu2 }
  0xab   :  { %v2743_v3 = vpop.f32.mrf.mxu3  ;;  %1364 = vperm.xlu1 %2315, %v1210_v1   ;;  %689 = vperm.xlu0 %2314, %v587_v2   ;;  %v1202_v1 = vld [vmem:[%s3525_s7 + $0xb0] sm:$0xff] }
  0xac   :  { %v2745_v5 = vpop.f32.mrf.mxu0 }
  0xad   :  { %v2767_v23 = vpop.permute.xlu0 %213 }
  0xae   :  { %v129_v27 = vpop.permute.xlu1 %128 }
  0xb2   :  { %1354 = vperm.xlu2 %2316, %v1208_v12   ;;  %v2801_v52 = vpop.f32.mrf.mxu2  ;;  %v1188_v12 = vld [vmem:[%s3525_s7 + $0x40] sm:$0xff] }
  0xb3   :  { %v2758_v16 = vpop.f32.mrf.mxu3  ;;  %1289 = vperm.xlu1 %2315, %v1195_v13   ;;  %1284 = vperm.xlu0 %2314, %v1194_v14   ;;  %v421_v13 = vadd.f32 %v2730_v60, %v129_v27  ;;  %v119_v60 = vpop.permute.xlu2 %118 }
  0xb4   :  { %v425_v17 = vpop.f32.mrf.mxu0 }
  0xb5   :  { %v2788_v38 = vpop.permute.xlu0 %198  ;;  %v426_v2 = vadd.f32 %v425_v17, %v139_v9 }
  0xb6   :  { %v2790_v39 = vpop.permute.xlu1 %203 }
  0xb7   :  { %v496_v9 = vmax.f32 %v426_v2, 0.0 }
  0xba   :  { %1279 = vperm.xlu2 %2316, %v1193_v21   ;;  %v423_v21 = vadd.f32 %v2745_v5, %v134_v49  ;;  %v460_v27 = vpop.f32.mrf.mxu2  ;;  %v476_v49 = vadd.f32 %v2743_v3, %v2694_v28  ;;  %v471_v28 = vadd.f32 %v2713_v43, %v2709_v40  ;;  %v1200_v40 = vld [vmem:[%s3525_s7 + $0xa0] sm:$0xff] }
  0xbb   :  { %v480_v29 = vpop.f32.mrf.mxu3  ;;  %1274 = vperm.xlu1 %2315, %v1192_v25   ;;  %1359 = vperm.xlu0 %2314, %v1209_v26   ;;  %v1962_v43 = vld [vmem:[%s3522_s4] sm:$0xf] }
  0xbc   :  { %v427_v30 = vpop.f32.mrf.mxu0  ;;  %v495_v5 = vmax.f32 %v423_v21, 0.0  ;;  %v516_v3 = vmax.f32 %v476_v49, 0.0  ;;  %v1761_v49 = vld [vmem:[%s3527_s9 + $0x8] sm:$0xff] }
  0xbd   :  { %v124_v55 = vpop.permute.xlu0 %123  ;;  %v428_v58 = vadd.f32 %v427_v30, %v144_v11  ;;  %v494_v30 = vmax.f32 %v421_v13, 0.0  ;;  %v468_v13 = vadd.f32 %v2696_v32, %v2760_v18  ;;  %v1199_v32 = vld [vmem:[%s3525_s7 + $0x98] sm:$0xff]  ;;  %v456_v18 = vadd.f32 %v2786_v37, %v2788_v38 }
  0xbe   :  { %v2803_v54 = vpop.permute.xlu1 %188 }
  0xbf   :  { %v508_v37 = vmax.f32 %v456_v18, 0.0 }
  0xc2   :  { %1264 = vperm.xlu2 %2316, %v1190_v31   ;;  %v481_v31 = vadd.f32 %v480_v29, %v2655_v6 }
  0xc3   :  { %v482_v42 = vpop.f32.mrf.mxu3  ;;  %1349 = vperm.xlu1 %2315, %v1207_v34   ;;  %1344 = vperm.xlu0 %2314, %v1206_v35   ;;  %v418_v34 = vadd.f32 %v2715_v45, %v124_v55  ;;  %v1186_v45 = vld [vmem:[%s3525_s7 + $0x30] sm:$0xff]  ;;  %v473_v55 = vadd.f32 %v2726_v57, %v2711_v41  ;;  %v466_v41 = vadd.f32 %v2679_v19, %v2732_v61  ;;  %v514_v19 = vmax.f32 %v471_v28, 0.0  ;;  %v1980_v28 = vld [vmem:[%s3522_s4 + $0x28] sm:$0xf0] }
  0xc4   :  { %v430_v44 = vpop.f32.mrf.mxu0  ;;  %v483_v17 = vadd.f32 %v482_v42, %v2671_v15  ;;  %v1187_v15 = vld [vmem:[%s3525_s7 + $0x38] sm:$0xff]  ;;  %v478_v42 = vadd.f32 %v2758_v16, %v2686_v24 }
  0xc5   :  { %v431_v50 = vadd.f32 %v430_v44, %v149_v7  ;;  %v1189_v7 = vld [vmem:[%s3525_s7 + $0x48] sm:$0xff]  ;;  %v515_v57 = vmax.f32 %v473_v55, 0.0  ;;  %v1986_v55 = vld [vmem:[%s3522_s4 + $0x30] sm:$0xf] }
  0xc6   :  { %v519_v6 = vmax.f32 %v483_v17, 0.0  ;;  %v458_v17 = vadd.f32 %v2801_v52, %v2790_v39  ;;  %v451_v39 = vadd.f32 %v2747_v8, %v2803_v54  ;;  %v1970_v8 = vld [vmem:[%s3522_s4 + $0x10] sm:$0xf] }
  0xc7   :  { %v498_v62 = vmax.f32 %v431_v50, 0.0  ;;  %v556_v50 = vpack.c.bf16 %v495_v5, %v494_v30  ;;  %v566_v21 = vpack.c.bf16 %v515_v57, %v514_v19  ;;  %v1182_v5 = vld [vmem:[%s3525_s7 + $0x10] sm:$0xff] }
  0xc8   :  { %v509_v38 = vmax.f32 %v458_v17, 0.0 }
  0xca   :  { %1339 = vperm.xlu2 %2316, %v1205_v46   ;;  %v114_v46 = vpop.permute.xlu1 %113 }
  0xcb   :  { %v485_v51 = vpop.f32.mrf.mxu3  ;;  %1334 = vperm.xlu1 %2315, %v1204_v47   ;;  %1269 = vperm.xlu0 %2314, %v1191_v48   ;;  %v109_v47 = vpop.permute.xlu0 %108  ;;  %v1203_v48 = vld [vmem:[%s3525_s7 + $0xb8] sm:$0xff] }
  0xcc   :  { %v432_v53 = vpop.f32.mrf.mxu0  ;;  %v486_v11 = vadd.f32 %v485_v51, %v2642_v63  ;;  %v518_v51 = vmax.f32 %v481_v31, 0.0  ;;  %v411_v24 = vadd.f32 %v2666_v10, %v109_v47  ;;  %v1184_v10 = vld [vmem:[%s3525_s7 + $0x20] sm:$0xff]  ;;  %v1964_v47 = vld [vmem:[%s3522_s4 + $0x8] sm:$0xf0] }
  0xcd   :  { %v433_v56 = vadd.f32 %v432_v53, %v2728_v59  ;;  %v497_v59 = vmax.f32 %v428_v58, 0.0  ;;  %v413_v53 = vadd.f32 %v2681_v20, %v114_v46  ;;  %v2242_v46 = vld [vmem:[%s3522_s4 + $0x4] sm:$0xf] }
  0xce   :  { %v520_v63 = vmax.f32 %v486_v11, 0.0  ;;  %v568_v58 = vpack.c.bf16 %v519_v6, %v518_v51  ;;  %v1181_v6 = vld [vmem:[%s3525_s7 + $0x8] sm:$0xff] }
  0xcf   :  { %v499_v0 = vmax.f32 %v433_v56, 0.0  ;;  %v557_v44 = vpack.c.bf16 %v497_v59, %v496_v9  ;;  %v517_v56 = vmax.f32 %v478_v42, 0.0  ;;  %v512_v59 = vmax.f32 %v466_v41, 0.0  ;;  %v2247_v51 = vld [vmem:[%s3522_s4 + $0x24] sm:$0xf0] }
  0xd0   :  { %v461_v9 = vadd.f32 %v460_v27, %v2784_v36  ;;  %v1185_v36 = vld [vmem:[%s3525_s7 + $0x28] sm:$0xff]  ;;  %v1967_v42 = vor.u32 %v2242_v46, %v1964_v47 }
  0xd1   :  { %v558_v14 = vpack.c.bf16 %v499_v0, %v498_v62  ;;  %v491_v62 = vmax.f32 %v413_v53, 0.0  ;;  %v490_v0 = vmax.f32 %v411_v24, 0.0  ;;  %v567_v2 = vpack.c.bf16 %v517_v56, %v516_v3  ;;  %v1972_v53 = vld [vmem:[%s3522_s4 + $0x18] sm:$0xf0]  ;;  %v2249_v56 = vld [vmem:[%s3522_s4 + $0x34] sm:$0xf0] }
  0xd2   :  { %1324 = vperm.xlu2 %2316, %v1202_v1   ;;  %v1201_v1 = vld [vmem:[%s3525_s7 + $0xa8] sm:$0xff]  ;;  %v510_v31 = vmax.f32 %v461_v9, 0.0  ;;  %v1987_v3 = vor.u32 %v2249_v56, %v1986_v55  ;;  %v2252_v9 = vld [vmem:[%s3522_s4 + $0x54] sm:$0xf] }
  0xd3   :  { %v487_v25 = vpop.f32.mrf.mxu3  ;;  %1259 = vperm.xlu1 %2315, %v1189_v7   ;;  %1254 = vperm.xlu0 %2314, %v1188_v12   ;;  %v2243_v7 = vld [vmem:[%s3522_s4 + $0x4] sm:$0xf0]  ;;  %v462_v12 = vpop.f32.mrf.mxu2  ;;  %v554_v61 = vpack.c.bf16 %v491_v62, %v490_v0  ;;  %v1994_v0 = vld [vmem:[%s3522_s4 + $0x40] sm:$0xf] }
  0xd4   :  { %v488_v26 = vadd.f32 %v487_v25, %v2653_v4  ;;  %925 = vmatpush.bf16.msrb.mxu1 %v558_v14  ;;  %v416_v4 = vadd.f32 %v2698_v33, %v119_v60  ;;  %v493_v33 = vmax.f32 %v418_v34, 0.0  ;;  %v1963_v14 = vor.u32 %v2243_v7, %v1962_v43  ;;  %v194_v60 = vpop.permute.xlu2 %193  ;;  %v1196_v34 = vld [vmem:[%s3525_s7 + $0x80] sm:$0xff]  ;;  %v2253_v43 = vld [vmem:[%s3522_s4 + $0x54] sm:$0xf0]  ;;  %v2959_v7 = vpop.permute.xlu0 %679 }
  0xd5   :  { %v463_v11 = vadd.f32 %v462_v12, %v2767_v23  ;;  %v513_v25 = vmax.f32 %v468_v13, 0.0  ;;  %v1198_v23 = vld [vmem:[%s3525_s7 + $0x90] sm:$0xff]  ;;  %v453_v27 = vadd.f32 %v2765_v22, %v194_v60  ;;  %v2245_v22 = vld [vmem:[%s3522_s4 + $0x14] sm:$0xf0]  ;;  %v2250_v12 = vld [vmem:[%s3522_s4 + $0x44] sm:$0xf] }
  0xd6   :  { %v521_v35 = vmax.f32 %v488_v26, 0.0  ;;  %v492_v16 = vmax.f32 %v416_v4, 0.0  ;;  %v1996_v13 = vld [vmem:[%s3522_s4 + $0x48] sm:$0xf0]  ;;  %v2257_v60 = vld [vmem:[%s3522_s4 + $0x74] sm:$0xf0] }
  0xd7   :  { %v511_v26 = vmax.f32 %v463_v11, 0.0  ;;  %v565_v30 = vpack.c.bf16 %v513_v25, %v512_v59  ;;  %v507_v54 = vmax.f32 %v453_v27, 0.0  ;;  %v2255_v25 = vld [vmem:[%s3522_s4 + $0x64] sm:$0xf0] }
  0xd8   :  { %926 = vmatpush.bf16.msrb.mxu1 %v557_v44  ;;  %v569_v29 = vpack.c.bf16 %v521_v35, %v520_v63  ;;  %v555_v20 = vpack.c.bf16 %v493_v33, %v492_v16  ;;  %v1183_v63 = vld [vmem:[%s3525_s7 + $0x18] sm:$0xff]  ;;  %v506_v35 = vmax.f32 %v451_v39, 0.0  ;;  %v563_v44 = vpack.c.bf16 %v509_v38, %v508_v37  ;;  %v2244_v33 = vld [vmem:[%s3522_s4 + $0x14] sm:$0xf]  ;;  %v2254_v38 = vld [vmem:[%s3522_s4 + $0x64] sm:$0xf] }
  0xd9   :  { %v564_v52 = vpack.c.bf16 %v511_v26, %v510_v31  ;;  %v1975_v16 = vor.u32 %v2244_v33, %v1972_v53  ;;  %v2018_v31 = vld [vmem:[%s3522_s4 + $0x70] sm:$0xf]  ;;  %v2012_v39 = vld [vmem:[%s3522_s4 + $0x68] sm:$0xf0] }
  0xda   :  { %1011 = vmatpush.bf16.msrb.mxu2 %v569_v29  ;;  %1249 = vperm.xlu2 %2316, %v1187_v15   ;;  %v1971_v15 = vor.u32 %v2245_v22, %v1970_v8  ;;  %v562_v4 = vpack.c.bf16 %v507_v54, %v506_v35  ;;  %v1180_v29 = vld [vmem:[%s3525_s7] sm:$0xff]  ;;  %v2015_v27 = vor.u32 %v2254_v38, %v2012_v39  ;;  %v2256_v22 = vld [vmem:[%s3522_s4 + $0x74] sm:$0xf]  ;;  %v2020_v54 = vld [vmem:[%s3522_s4 + $0x78] sm:$0xf0] }
  0xdb   :  { %1244 = vperm.xlu1 %2315, %v1186_v45   ;;  %1329 = vperm.xlu0 %2314, %v1203_v48   ;;  %v1197_v45 = vld [vmem:[%s3525_s7 + $0x88] sm:$0xff]  ;;  %v1760_v48 = vld [vmem:[%s3527_s9] sm:$0xff]  ;;  %v2050_v39 = vld [vmem:[%s3522_s4 + $0xb0] sm:$0xf] }
  0xdc   :  { %927 = vmatpush.bf16.msrb.mxu1 %v556_v50  ;;  %v1978_v50 = vld [vmem:[%s3522_s4 + $0x20] sm:$0xf]  ;;  %v2969_v59 = vpop.permute.xlu0 %654  ;;  %v2028_v33 = vld [vmem:[%s3522_s4 + $0x88] sm:$0xf0] }
  0xdd   :  { %v1979_v24 = vor.u32 %v2247_v51, %v1978_v50  ;;  %v2261_v50 = vld [vmem:[%s3522_s4 + $0x94] sm:$0xf0]  ;;  %v2258_v51 = vld [vmem:[%s3522_s4 + $0x84] sm:$0xf] }
  0xde   :  { %1012 = vmatpush.bf16.msrb.mxu2 %v568_v58  ;;  %v2246_v58 = vld [vmem:[%s3522_s4 + $0x24] sm:$0xf] }
  0xdf   :  { %v1983_v62 = vor.u32 %v2246_v58, %v1980_v28 }
  0xe0   :  { %928 = vmatpush.bf16.msrb.mxu1 %v555_v20  ;;  %v2251_v20 = vld [vmem:[%s3522_s4 + $0x44] sm:$0xf0] }
  0xe1   :  { %v1995_v41 = vor.u32 %v2251_v20, %v1994_v0 }
  0xe2   :  { %1013 = vmatpush.bf16.msrb.mxu2 %v567_v2  ;;  %1234 = vperm.xlu2 %2316, %v1184_v10   ;;  %v2248_v10 = vld [vmem:[%s3522_s4 + $0x34] sm:$0xf]  ;;  %v2951_v2 = vpop.permute.xlu2 %674 }
  0xe3   :  { %1319 = vperm.xlu1 %2315, %v1201_v1   ;;  %1314 = vperm.xlu0 %2314, %v1200_v40   ;;  %v1988_v1 = vld [vmem:[%s3522_s4 + $0x38] sm:$0xf0]  ;;  %v2002_v40 = vld [vmem:[%s3522_s4 + $0x50] sm:$0xf] }
  0xe4   :  { %929 = vmatpush.bf16.msrb.mxu1 %v554_v61  ;;  %v1991_v57 = vor.u32 %v2248_v10, %v1988_v1  ;;  %v2003_v19 = vor.u32 %v2253_v43, %v2002_v40  ;;  %v2985_v26 = vpop.permute.xlu0 %759  ;;  %v2042_v10 = vld [vmem:[%s3522_s4 + $0xa0] sm:$0xf]  ;;  %v2263_v1 = vld [vmem:[%s3522_s4 + $0xa4] sm:$0xf0]  ;;  %v2036_v40 = vld [vmem:[%s3522_s4 + $0x98] sm:$0xf0] }
  0xe6   :  { %1014 = vmatpush.bf16.msrb.mxu2 %v566_v21  ;;  %v2010_v21 = vld [vmem:[%s3522_s4 + $0x60] sm:$0xf] }
  0xe7   :  { %930 = vmatmul.bf16.vlgmr.msrb.gmra.mxu1 %v1963_v14  ;;  %v1999_v14 = vor.u32 %v2250_v12, %v1996_v13  ;;  %v2011_v18 = vor.u32 %v2255_v25, %v2010_v21  ;;  %v2043_v12 = vor.u32 %v2263_v1, %v2042_v10 }
  0xea   :  { %1015 = vmatpush.bf16.msrb.mxu2 %v565_v30  ;;  %1309 = vperm.xlu2 %2316, %v1199_v32   ;;  %v2967_v61 = vpop.permute.xlu2 %669  ;;  %v2004_v32 = vld [vmem:[%s3522_s4 + $0x58] sm:$0xf0] }
  0xeb   :  { %1304 = vperm.xlu1 %2315, %v1198_v23   ;;  %1239 = vperm.xlu0 %2314, %v1185_v36   ;;  %v2007_v17 = vor.u32 %v2252_v9, %v2004_v32  ;;  %v2989_v23 = vpop.permute.xlu1 %664 }
  0xec   :  { %v2991_v36 = vpop.permute.xlu0 %744 }
  0xee   :  { %1016 = vmatpush.bf16.msrb.mxu2 %v564_v52  ;;  %v2019_v52 = vor.u32 %v2257_v60, %v2018_v31 }
  0xf2   :  { %1017 = vmatpush.bf16.msrb.mxu2 %v563_v44  ;;  %1294 = vperm.xlu2 %2316, %v1196_v34   ;;  %v2971_v11 = vpop.permute.xlu2 %754  ;;  %v2026_v44 = vld [vmem:[%s3522_s4 + $0x80] sm:$0xf] }
  0xf3   :  { %1229 = vperm.xlu1 %2315, %v1183_v63   ;;  %1224 = vperm.xlu0 %2314, %v1182_v5   ;;  %v3007_v34 = vpop.permute.xlu1 %659  ;;  %v2259_v5 = vld [vmem:[%s3522_s4 + $0x84] sm:$0xf0] }
  0xf4   :  { %v3009_v63 = vpop.permute.xlu0 %639  ;;  %v2027_v46 = vor.u32 %v2259_v5, %v2026_v44  ;;  %v2044_v44 = vld [vmem:[%s3522_s4 + $0xa8] sm:$0xf0] }
  0xf6   :  { %1018 = vmatpush.bf16.msrb.mxu2 %v562_v4  ;;  %v2023_v4 = vor.u32 %v2256_v22, %v2020_v54 }
  0xf7   :  { %935 = vmatmul.bf16.gmra.mxu1 %v1971_v15 }
  0xf9   :  { %1019 = vmatmul.bf16.vlgmr.msrb.gmra.mxu2 %v1967_v42 }
  0xfa   :  { %1219 = vperm.xlu2 %2316, %v1181_v6   ;;  %v2987_v30 = vpop.permute.xlu2 %649 }
  0xfb   :  { %1214 = vperm.xlu1 %2315, %v1180_v29   ;;  %1299 = vperm.xlu0 %2314, %v1197_v45   ;;  %v3019_v8 = vpop.permute.xlu1 %644 }
  0xfc   :  { %v3027_v47 = vpop.permute.xlu0 %624 }
 0x102   :  { %v2999_v37 = vpop.permute.xlu2 %634 }
 0x103   :  { %1764 = vperm.xlu1 %2315, %v1760_v48   ;;  %1769 = vperm.xlu0 %2314, %v1761_v49   ;;  %v3031_v6 = vpop.permute.xlu1 %749  ;;  %v2034_v49 = vld [vmem:[%s3522_s4 + $0x90] sm:$0xf] }
 0x104   :  { %v3033_v45 = vpop.permute.xlu0 %729  ;;  %v2035_v53 = vor.u32 %v2261_v50, %v2034_v49 }
 0x107   :  { %940 = vmatmul.bf16.gmra.mxu1 %v1979_v24 }
 0x109   :  { %1024 = vmatmul.bf16.gmra.mxu2 %v1975_v16  ;;  %v2031_v16 = vor.u32 %v2258_v51, %v2028_v33 }
 0x10a   :  { %v3011_v35 = vpop.permute.xlu2 %739 }
 0x10b   :  { %v3047_v55 = vpop.permute.xlu1 %734 }
 0x10c   :  { %v3049_v56 = vpop.permute.xlu0 %714 }
 0x112   :  { %v3029_v42 = vpop.permute.xlu2 %724 }
 0x113   :  { %v630_v20 = vpop.permute.xlu1 %629 }
 0x117   :  { %945 = vmatmul.bf16.gmra.mxu1 %v1987_v3 }
 0x119   :  { %1029 = vmatmul.bf16.gmra.mxu2 %v1983_v62 }
 0x11a   :  { %v620_v48 = vpop.permute.xlu2 %619 }
 0x122   :  { %v605_v58 = vpop.permute.xlu2 %604 }
 0x127   :  { %950 = vmatmul.bf16.gmra.mxu1 %v1995_v41  ;;  %v610_v41 = vpop.permute.xlu0 %609 }
 0x129   :  { %1034 = vmatmul.bf16.gmra.mxu2 %v1991_v57  ;;  %v2260_v57 = vld [vmem:[%s3522_s4 + $0x94] sm:$0xf] }
 0x12a   :  { %v2039_v21 = vor.u32 %v2260_v57, %v2036_v40 }
 0x137   :  { %955 = vmatmul.bf16.gmra.mxu1 %v2003_v19 }
 0x139   :  { %1039 = vmatmul.bf16.gmra.mxu2 %v1999_v14 }
 0x147   :  { %960 = vmatmul.bf16.gmra.mxu1 %v2011_v18  ;;  %v615_v18 = vpop.permute.xlu1 %614 }
 0x149   :  { %1044 = vmatmul.bf16.gmra.mxu2 %v2007_v17 }
 0x157   :  { %965 = vmatmul.bf16.gmra.mxu1 %v2019_v52  ;;  %v2265_v52 = vld [vmem:[%s3522_s4 + $0xb4] sm:$0xf0] }
 0x158   :  { %v2051_v22 = vor.u32 %v2265_v52, %v2050_v39 }
 0x159   :  { %1049 = vmatmul.bf16.gmra.mxu2 %v2015_v27  ;;  %v2262_v27 = vld [vmem:[%s3522_s4 + $0xa4] sm:$0xf] }
 0x164   :  { %v931_v15 = vpop.f32.mrf.mxu1 }
 0x165   :  { %v932_v28 = vadd.f32 %v931_v15, %v605_v58  ;;  %v2264_v58 = vld [vmem:[%s3522_s4 + $0xb4] sm:$0xf] }
 0x167   :  { %970 = vmatmul.bf16.gmra.mxu1 %v2027_v46 }
 0x169   :  { %1054 = vmatmul.bf16.gmra.mxu2 %v2023_v4  ;;  %v2047_v4 = vor.u32 %v2262_v27, %v2044_v44 }
 0x16c   :  { %v933_v29 = vpop.f32.mrf.mxu1 }
 0x16d   :  { %v934_v43 = vadd.f32 %v933_v29, %v610_v41 }
 0x174   :  { %v936_v24 = vpop.f32.mrf.mxu1 }
 0x175   :  { %v937_v17 = vadd.f32 %v936_v24, %v615_v18 }
 0x177   :  { %975 = vmatmul.bf16.gmra.mxu1 %v2035_v53 }
 0x179   :  { %1059 = vmatmul.bf16.gmra.mxu2 %v2031_v16  ;;  %v2267_v16 = vld [vmem:[%s3522_s4 + $0xc4] sm:$0xf0] }
 0x17c   :  { %v938_v3 = vpop.f32.mrf.mxu1  ;;  %v1020_v62 = vpop.f32.mrf.mxu2 }
 0x17d   :  { %v1021_v0 = vadd.f32 %v1020_v62, %v932_v28  ;;  %v939_v5 = vadd.f32 %v938_v3, %v620_v48  ;;  %v2058_v48 = vld [vmem:[%s3522_s4 + $0xc0] sm:$0xf]  ;;  %v2052_v28 = vld [vmem:[%s3522_s4 + $0xb8] sm:$0xf0] }
 0x17e   :  { %v2059_v3 = vor.u32 %v2267_v16, %v2058_v48  ;;  %v2055_v1 = vor.u32 %v2264_v58, %v2052_v28  ;;  %v2270_v48 = vld [vmem:[%s3522_s4 + $0xe4] sm:$0xf]  ;;  %v2076_v16 = vld [vmem:[%s3522_s4 + $0xe8] sm:$0xf0] }
 0x17f   :  { %v1100_v25 = vmax.f32 %v1021_v0, 0.0 }
 0x184   :  { %v941_v13 = vpop.f32.mrf.mxu1  ;;  %v1022_v19 = vpop.f32.mrf.mxu2 }
 0x185   :  { %v1023_v14 = vadd.f32 %v1022_v19, %v934_v43  ;;  %v942_v51 = vadd.f32 %v941_v13, %v3027_v47 }
 0x187   :  { %v1101_v9 = vmax.f32 %v1023_v14, 0.0  ;;  %980 = vmatmul.bf16.gmra.mxu1 %v2043_v12  ;;  %v2269_v14 = vld [vmem:[%s3522_s4 + $0xd4] sm:$0xf0] }
 0x189   :  { %1064 = vmatmul.bf16.gmra.mxu2 %v2039_v21  ;;  %v3063_v32 = vpack.c.bf16 %v1101_v9, %v1100_v25  ;;  %v2266_v21 = vld [vmem:[%s3522_s4 + $0xc4] sm:$0xf] }
 0x18c   :  { %v943_v31 = vpop.f32.mrf.mxu1  ;;  %v1025_v60 = vpop.f32.mrf.mxu2 }
 0x18d   :  { %v1026_v38 = vadd.f32 %v1025_v60, %v937_v17  ;;  %v944_v47 = vadd.f32 %v943_v31, %v630_v20  ;;  %v2066_v20 = vld [vmem:[%s3522_s4 + $0xd0] sm:$0xf] }
 0x18e   :  { %v2067_v9 = vor.u32 %v2269_v14, %v2066_v20  ;;  %v3145_v20 = vpop.permute.xlu2 %709 }
 0x18f   :  { %v1102_v29 = vmax.f32 %v1026_v38, 0.0 }
 0x194   :  { %v946_v54 = vpop.f32.mrf.mxu1  ;;  %v1027_v46 = vpop.f32.mrf.mxu2 }
 0x195   :  { %v1028_v15 = vadd.f32 %v1027_v46, %v939_v5  ;;  %v947_v43 = vadd.f32 %v946_v54, %v2999_v37  ;;  %v2060_v37 = vld [vmem:[%s3522_s4 + $0xc8] sm:$0xf0]  ;;  %v2271_v54 = vld [vmem:[%s3522_s4 + $0xe4] sm:$0xf0]  ;;  %v2268_v46 = vld [vmem:[%s3522_s4 + $0xd4] sm:$0xf] }
 0x196   :  { %v2063_v60 = vor.u32 %v2266_v21, %v2060_v37 }
 0x197   :  { %v1103_v49 = vmax.f32 %v1028_v15, 0.0  ;;  %985 = vmatmul.bf16.gmra.mxu1 %v2051_v22 }
 0x199   :  { %1069 = vmatmul.bf16.gmra.mxu2 %v2047_v4  ;;  %v3077_v50 = vpack.c.bf16 %v1103_v49, %v1102_v29 }
 0x19c   :  { %v948_v33 = vpop.f32.mrf.mxu1  ;;  %v1030_v53 = vpop.f32.mrf.mxu2 }
 0x19d   :  { %v1031_v24 = vadd.f32 %v1030_v53, %v942_v51  ;;  %v949_v25 = vadd.f32 %v948_v33, %v3009_v63  ;;  %v2074_v63 = vld [vmem:[%s3522_s4 + $0xe0] sm:$0xf]  ;;  %v2082_v53 = vld [vmem:[%s3522_s4 + $0xf0] sm:$0xf] }
 0x19e   :  { %v2075_v15 = vor.u32 %v2271_v54, %v2074_v63  ;;  %v695_v54 = vpop.permute.xlu0 %694 }
 0x19f   :  { %v1104_v41 = vmax.f32 %v1031_v24, 0.0  ;;  %v2273_v24 = vld [vmem:[%s3522_s4 + $0xf4] sm:$0xf0] }
 0x1a0   :  { %v2083_v58 = vor.u32 %v2273_v24, %v2082_v53 }
 0x1a4   :  { %v951_v62 = vpop.f32.mrf.mxu1  ;;  %v1032_v0 = vpop.f32.mrf.mxu2 }
 0x1a5   :  { %v1033_v10 = vadd.f32 %v1032_v0, %v944_v47  ;;  %v952_v27 = vadd.f32 %v951_v62, %v3019_v8  ;;  %v2068_v8 = vld [vmem:[%s3522_s4 + $0xd8] sm:$0xf0] }
 0x1a6   :  { %v2071_v49 = vor.u32 %v2268_v46, %v2068_v8 }
 0x1a7   :  { %v1105_v57 = vmax.f32 %v1033_v10, 0.0  ;;  %990 = vmatmul.bf16.gmra.mxu1 %v2059_v3  ;;  %v2079_v3 = vor.u32 %v2270_v48, %v2076_v16  ;;  %v2272_v10 = vld [vmem:[%s3522_s4 + $0xf4] sm:$0xf]  ;;  %v720_v16 = vpop.permute.xlu1 %719 }
 0x1a9   :  { %1074 = vmatmul.bf16.gmra.mxu2 %v2055_v1  ;;  %v3092_v40 = vpack.c.bf16 %v1105_v57, %v1104_v41  ;;  %v2084_v1 = vld [vmem:[%s3522_s4 + $0xf8] sm:$0xf0] }
 0x1ac   :  { %v3095_v12 = vpop.f32.mrf.mxu1  ;;  %v1035_v13 = vpop.f32.mrf.mxu2 }
 0x1ad   :  { %v1036_v19 = vadd.f32 %v1035_v13, %v947_v43  ;;  %v2087_v43 = vor.u32 %v2272_v10, %v2084_v1 }
 0x1af   :  { %v1106_v38 = vmax.f32 %v1036_v19, 0.0 }
 0x1b4   :  { %v956_v18 = vpop.f32.mrf.mxu1  ;;  %v1037_v17 = vpop.f32.mrf.mxu2 }
 0x1b5   :  { %v1038_v31 = vadd.f32 %v1037_v17, %v949_v25  ;;  %v957_v46 = vadd.f32 %v956_v18, %v2969_v59 }
 0x1b7   :  { %v1107_v39 = vmax.f32 %v1038_v31, 0.0  ;;  %995 = vmatmul.bf16.gmra.mxu1 %v2067_v9 }
 0x1b9   :  { %1079 = vmatmul.bf16.gmra.mxu2 %v2063_v60  ;;  %v3110_v52 = vpack.c.bf16 %v1107_v39, %v1106_v38 }
 0x1bc   :  { %v958_v44 = vpop.f32.mrf.mxu1  ;;  %v1040_v5 = vpop.f32.mrf.mxu2 }
 0x1bd   :  { %v3113_v22 = vadd.f32 %v1040_v5, %v952_v27  ;;  %v959_v39 = vadd.f32 %v958_v44, %v3007_v34 }
 0x1c4   :  { %v961_v4 = vpop.f32.mrf.mxu1  ;;  %v1042_v29 = vpop.f32.mrf.mxu2 }
 0x1c5   :  { %v962_v31 = vadd.f32 %v961_v4, %v2989_v23 }
 0x1c7   :  { %1000 = vmatmul.bf16.gmra.mxu1 %v2075_v15  ;;  %v685_v15 = vpop.permute.xlu2 %684 }
 0x1c9   :  { %1084 = vmatmul.bf16.gmra.mxu2 %v2071_v49 }
 0x1cc   :  { %v963_v51 = vpop.f32.mrf.mxu1  ;;  %v1045_v33 = vpop.f32.mrf.mxu2 }
 0x1cd   :  { %v964_v21 = vadd.f32 %v963_v51, %v2967_v61  ;;  %v1046_v49 = vadd.f32 %v1045_v33, %v957_v46 }
 0x1d4   :  { %v966_v28 = vpop.f32.mrf.mxu1  ;;  %v1047_v47 = vpop.f32.mrf.mxu2 }
 0x1d5   :  { %v967_v14 = vadd.f32 %v966_v28, %v2951_v2  ;;  %v1048_v2 = vadd.f32 %v1047_v47, %v959_v39  ;;  %v690_v28 = vpop.permute.xlu0 %689  ;;  %v1108_v47 = vmax.f32 %v3113_v22, 0.0 }
 0x1d7   :  { %1005 = vmatmul.bf16.gmra.mxu1 %v2083_v58  ;;  %v1111_v44 = vmax.f32 %v1048_v2, 0.0  ;;  %v1110_v58 = vmax.f32 %v1046_v49, 0.0 }
 0x1d9   :  { %1089 = vmatmul.bf16.gmra.mxu2 %v2079_v3  ;;  %v1169_v18 = vpack.c.bf16 %v1111_v44, %v1110_v58 }
 0x1dc   :  { %v968_v62 = vpop.f32.mrf.mxu1  ;;  %v1050_v0 = vpop.f32.mrf.mxu2 }
 0x1dd   :  { %v969_v37 = vadd.f32 %v968_v62, %v2959_v7  ;;  %v1051_v27 = vadd.f32 %v1050_v0, %v962_v31  ;;  %v954_v7 = vadd.f32 %v3095_v12, %v2987_v30 }
 0x1df   :  { %v1112_v51 = vmax.f32 %v1051_v27, 0.0  ;;  %v1043_v34 = vadd.f32 %v1042_v29, %v954_v7  ;;  %v705_v29 = vpop.permute.xlu1 %704 }
 0x1e1   :  { %v1109_v59 = vmax.f32 %v1043_v34, 0.0 }
 0x1e3   :  { %v1168_v62 = vpack.c.bf16 %v1109_v59, %v1108_v47  ;;  %v2114_v47 = vld [vmem:[%s3524_s6 + $0x30] sm:$0xf] }
 0x1e4   :  { %v971_v41 = vpop.f32.mrf.mxu1  ;;  %v1052_v57 = vpop.f32.mrf.mxu2 }
 0x1e5   :  { %v1053_v60 = vadd.f32 %v1052_v57, %v964_v21  ;;  %v972_v23 = vadd.f32 %v971_v41, %v685_v15  ;;  %v2275_v21 = vld [vmem:[%s3524_s6 + $0x4] sm:$0xf0] }
 0x1e7   :  { %v1113_v8 = vmax.f32 %v1053_v60, 0.0  ;;  %v700_v22 = vpop.permute.xlu1 %699 }
 0x1e9   :  { %1094 = vmatmul.bf16.gmra.mxu2 %v2087_v43  ;;  %v1170_v48 = vpack.c.bf16 %v1113_v8, %v1112_v51 }
 0x1ec   :  { %v973_v13 = vpop.f32.mrf.mxu1  ;;  %v1055_v19 = vpop.f32.mrf.mxu2 }
 0x1ed   :  { %v1056_v25 = vadd.f32 %v1055_v19, %v967_v14  ;;  %v974_v3 = vadd.f32 %v973_v13, %v690_v28  ;;  %v2090_v14 = vld [vmem:[%s3524_s6] sm:$0xf] }
 0x1ef   :  { %v1114_v5 = vmax.f32 %v1056_v25, 0.0 }
 0x1f4   :  { %v976_v9 = vpop.f32.mrf.mxu1  ;;  %v1057_v17 = vpop.f32.mrf.mxu2 }
 0x1f5   :  { %v1058_v38 = vadd.f32 %v1057_v17, %v969_v37  ;;  %v977_v41 = vadd.f32 %v976_v9, %v695_v54  ;;  %v2091_v9 = vor.u32 %v2275_v21, %v2090_v14 }
 0x1f7   :  { %v1115_v63 = vmax.f32 %v1058_v38, 0.0 }
 0x1f9   :  { %v1171_v61 = vpack.c.bf16 %v1115_v63, %v1114_v5  ;;  %v2098_v5 = vld [vmem:[%s3524_s6 + $0x10] sm:$0xf]  ;;  %v2277_v63 = vld [vmem:[%s3524_s6 + $0x14] sm:$0xf0] }
 0x1fb   :  { %1532 = vmatpush.bf16.msrb.mxu3 %v1171_v61 }
 0x1fc   :  { %v978_v4 = vpop.f32.mrf.mxu1  ;;  %v1060_v53 = vpop.f32.mrf.mxu2 }
 0x1fd   :  { %v1061_v24 = vadd.f32 %v1060_v53, %v972_v23  ;;  %v979_v13 = vadd.f32 %v978_v4, %v700_v22  ;;  %v2106_v23 = vld [vmem:[%s3524_s6 + $0x20] sm:$0xf]  ;;  %v2279_v4 = vld [vmem:[%s3524_s6 + $0x24] sm:$0xf0]  ;;  %v2285_v22 = vld [vmem:[%s3524_s6 + $0x54] sm:$0xf0] }
 0x1ff   :  { %1533 = vmatpush.bf16.msrb.mxu3 %v1170_v48  ;;  %v1116_v0 = vmax.f32 %v1061_v24, 0.0  ;;  %v2107_v24 = vor.u32 %v2279_v4, %v2106_v23 }
 0x203   :  { %1534 = vmatpush.bf16.msrb.mxu3 %v1169_v18 }
 0x204   :  { %v981_v30 = vpop.f32.mrf.mxu1  ;;  %v1062_v12 = vpop.f32.mrf.mxu2 }
 0x205   :  { %v1063_v33 = vadd.f32 %v1062_v12, %v974_v3  ;;  %v2281_v3 = vld [vmem:[%s3524_s6 + $0x34] sm:$0xf0] }
 0x206   :  { %v2115_v12 = vor.u32 %v2281_v3, %v2114_v47  ;;  %v3254_v3 = vpop.permute.xlu1 %1364 }
 0x207   :  { %v1117_v10 = vmax.f32 %v1063_v33, 0.0  ;;  %1535 = vmatpush.bf16.msrb.mxu3 %v1168_v62 }
 0x209   :  { %v3156_v1 = vpack.c.bf16 %v1117_v10, %v1116_v0  ;;  %v2283_v10 = vld [vmem:[%s3524_s6 + $0x44] sm:$0xf0] }
 0x20b   :  { %1536 = vmatpush.bf16.msrb.mxu3 %v3110_v52 }
 0x20c   :  { %v983_v57 = vpop.f32.mrf.mxu1  ;;  %v1065_v43 = vpop.f32.mrf.mxu2 }
 0x20d   :  { %v1066_v19 = vadd.f32 %v1065_v43, %v977_v41  ;;  %v984_v27 = vadd.f32 %v983_v57, %v3145_v20 }
 0x20f   :  { %1537 = vmatpush.bf16.msrb.mxu3 %v3092_v40  ;;  %v1118_v17 = vmax.f32 %v1066_v19, 0.0  ;;  %v2130_v19 = vld [vmem:[%s3524_s6 + $0x50] sm:$0xf] }
 0x210   :  { %v2131_v21 = vor.u32 %v2285_v22, %v2130_v19  ;;  %v2280_v19 = vld [vmem:[%s3524_s6 + $0x34] sm:$0xf]  ;;  %v2116_v22 = vld [vmem:[%s3524_s6 + $0x38] sm:$0xf0] }
 0x213   :  { %1538 = vmatpush.bf16.msrb.mxu3 %v3077_v50  ;;  %v982_v50 = vadd.f32 %v981_v30, %v705_v29 }
 0x214   :  { %v1067_v37 = vpop.f32.mrf.mxu2  ;;  %v986_v52 = vpop.f32.mrf.mxu1 }
 0x215   :  { %v1068_v25 = vadd.f32 %v1067_v37, %v979_v13  ;;  %v987_v7 = vadd.f32 %v986_v52, %v3049_v56 }
 0x217   :  { %v1119_v31 = vmax.f32 %v1068_v25, 0.0  ;;  %1539 = vmatpush.bf16.msrb.mxu3 %v3063_v32  ;;  %v2099_v32 = vor.u32 %v2277_v63, %v2098_v5 }
 0x219   :  { %v3168_v40 = vpack.c.bf16 %v1119_v31, %v1118_v17 }
 0x21a   :  { %1540 = vmatmul.bf16.vlgmr.msrb.gmra.mxu3 %v2091_v9 }
 0x21c   :  { %v1070_v60 = vpop.f32.mrf.mxu2  ;;  %v988_v39 = vpop.f32.mrf.mxu1 }
 0x21d   :  { %v1071_v38 = vadd.f32 %v1070_v60, %v982_v50  ;;  %v989_v51 = vadd.f32 %v988_v39, %v720_v16  ;;  %v2138_v50 = vld [vmem:[%s3524_s6 + $0x60] sm:$0xf]  ;;  %v2287_v60 = vld [vmem:[%s3524_s6 + $0x64] sm:$0xf0] }
 0x21e   :  { %v2139_v63 = vor.u32 %v2287_v60, %v2138_v50  ;;  %v2282_v50 = vld [vmem:[%s3524_s6 + $0x44] sm:$0xf]  ;;  %v2124_v60 = vld [vmem:[%s3524_s6 + $0x48] sm:$0xf0] }
 0x21f   :  { %v1120_v2 = vmax.f32 %v1071_v38, 0.0 }
 0x224   :  { %v1072_v54 = vpop.f32.mrf.mxu2  ;;  %v991_v15 = vpop.f32.mrf.mxu1 }
 0x225   :  { %v1073_v46 = vadd.f32 %v1072_v54, %v984_v27  ;;  %v992_v56 = vadd.f32 %v991_v15, %v3029_v42  ;;  %v2122_v42 = vld [vmem:[%s3524_s6 + $0x40] sm:$0xf] }
 0x226   :  { %v2123_v41 = vor.u32 %v2283_v10, %v2122_v42  ;;  %v3268_v10 = vpop.permute.xlu2 %1369 }
 0x227   :  { %v1121_v8 = vmax.f32 %v1073_v46, 0.0 }
 0x229   :  { %v3177_v61 = vpack.c.bf16 %v1121_v8, %v1120_v2 }
 0x22a   :  { %1545 = vmatmul.bf16.gmra.mxu3 %v2099_v32 }
 0x22c   :  { %v1075_v20 = vpop.f32.mrf.mxu2  ;;  %v993_v53 = vpop.f32.mrf.mxu1 }
 0x22d   :  { %v1076_v49 = vadd.f32 %v1075_v20, %v987_v7  ;;  %v994_v15 = vadd.f32 %v993_v53, %v3033_v45  ;;  %v2289_v45 = vld [vmem:[%s3524_s6 + $0x74] sm:$0xf0] }
 0x22f   :  { %v1122_v48 = vmax.f32 %v1076_v49, 0.0 }
 0x234   :  { %v1077_v34 = vpop.f32.mrf.mxu2  ;;  %v996_v28 = vpop.f32.mrf.mxu1 }
 0x235   :  { %v1078_v44 = vadd.f32 %v1077_v34, %v989_v51  ;;  %v997_v46 = vadd.f32 %v996_v28, %v3047_v55  ;;  %v2146_v55 = vld [vmem:[%s3524_s6 + $0x70] sm:$0xf]  ;;  %v2100_v28 = vld [vmem:[%s3524_s6 + $0x18] sm:$0xf0] }
 0x237   :  { %v1123_v58 = vmax.f32 %v1078_v44, 0.0  ;;  %v2147_v44 = vor.u32 %v2289_v45, %v2146_v55  ;;  %v2286_v55 = vld [vmem:[%s3524_s6 + $0x64] sm:$0xf]  ;;  %v2140_v45 = vld [vmem:[%s3524_s6 + $0x68] sm:$0xf0] }
 0x239   :  { %v3186_v59 = vpack.c.bf16 %v1123_v58, %v1122_v48  ;;  %v2291_v48 = vld [vmem:[%s3524_s6 + $0x84] sm:$0xf0]  ;;  %v2274_v58 = vld [vmem:[%s3524_s6 + $0x4] sm:$0xf] }
 0x23a   :  { %1550 = vmatmul.bf16.gmra.mxu3 %v2107_v24  ;;  %v2154_v24 = vld [vmem:[%s3524_s6 + $0x80] sm:$0xf] }
 0x23c   :  { %v1080_v16 = vpop.f32.mrf.mxu2  ;;  %v998_v33 = vpop.f32.mrf.mxu1 }
 0x23d   :  { %v1081_v18 = vadd.f32 %v1080_v16, %v992_v56  ;;  %v2155_v56 = vor.u32 %v2291_v48, %v2154_v24  ;;  %v2293_v16 = vld [vmem:[%s3524_s6 + $0x94] sm:$0xf0]  ;;  %v2143_v48 = vor.u32 %v2286_v55, %v2140_v45 }
 0x23f   :  { %v1124_v34 = vmax.f32 %v1081_v18, 0.0  ;;  %v2276_v18 = vld [vmem:[%s3524_s6 + $0x14] sm:$0xf] }
 0x244   :  { %v1082_v30 = vpop.f32.mrf.mxu2  ;;  %v1001_v0 = vpop.f32.mrf.mxu1 }
 0x245   :  { %v1002_v39 = vadd.f32 %v1001_v0, %v2991_v36  ;;  %v1083_v36 = vadd.f32 %v1082_v30, %v994_v15  ;;  %v2170_v30 = vld [vmem:[%s3524_s6 + $0xa0] sm:$0xf]  ;;  %v2132_v15 = vld [vmem:[%s3524_s6 + $0x58] sm:$0xf0] }
 0x24a   :  { %1555 = vmatmul.bf16.gmra.mxu3 %v2115_v12  ;;  %v2295_v12 = vld [vmem:[%s3524_s6 + $0xa4] sm:$0xf0] }
 0x24b   :  { %v2171_v0 = vor.u32 %v2295_v12, %v2170_v30 }
 0x24c   :  { %v1085_v62 = vpop.f32.mrf.mxu2  ;;  %v1003_v57 = vpop.f32.mrf.mxu1 }
 0x24d   :  { %v1004_v9 = vadd.f32 %v1003_v57, %v3031_v6  ;;  %v1086_v7 = vadd.f32 %v1085_v62, %v997_v46  ;;  %v2108_v62 = vld [vmem:[%s3524_s6 + $0x28] sm:$0xf0]  ;;  %v3275_v57 = vpop.permute.xlu2 %1354  ;;  %v2194_v46 = vld [vmem:[%s3524_s6 + $0xd0] sm:$0xf] }
 0x24f   :  { %v1126_v23 = vmax.f32 %v1086_v7, 0.0 }
 0x254   :  { %v1087_v29 = vpop.f32.mrf.mxu2  ;;  %v1006_v14 = vpop.f32.mrf.mxu1 }
 0x255   :  { %v1007_v52 = vadd.f32 %v1006_v14, %v2971_v11  ;;  %v999_v11 = vadd.f32 %v998_v33, %v3011_v35  ;;  %v1125_v35 = vmax.f32 %v1083_v36, 0.0  ;;  %v2278_v33 = vld [vmem:[%s3524_s6 + $0x24] sm:$0xf] }
 0x256   :  { %v2111_v42 = vor.u32 %v2278_v33, %v2108_v62 }
 0x257   :  { %v1088_v32 = vadd.f32 %v1087_v29, %v999_v11  ;;  %v1176_v53 = vpack.c.bf16 %v1125_v35, %v1124_v34  ;;  %v3270_v29 = vpop.permute.xlu1 %1289  ;;  %v2202_v35 = vld [vmem:[%s3524_s6 + $0xe0] sm:$0xf]  ;;  %v2303_v34 = vld [vmem:[%s3524_s6 + $0xe4] sm:$0xf0] }
 0x258   :  { %v2203_v24 = vor.u32 %v2303_v34, %v2202_v35 }
 0x259   :  { %v1127_v49 = vmax.f32 %v1088_v32, 0.0 }
 0x25a   :  { %1560 = vmatmul.bf16.gmra.mxu3 %v2123_v41  ;;  %v2178_v41 = vld [vmem:[%s3524_s6 + $0xb0] sm:$0xf] }
 0x25b   :  { %v1177_v4 = vpack.c.bf16 %v1127_v49, %v1126_v23 }
 0x25c   :  { %v1090_v43 = vpop.f32.mrf.mxu2  ;;  %v1008_v25 = vpop.f32.mrf.mxu1 }
 0x25d   :  { %v1009_v17 = vadd.f32 %v1008_v25, %v2985_v26  ;;  %v1091_v6 = vadd.f32 %v1090_v43, %v1002_v39  ;;  %v2297_v43 = vld [vmem:[%s3524_s6 + $0xb4] sm:$0xf0]  ;;  %v3290_v25 = vpop.permute.xlu2 %1279 }
 0x25f   :  { %v1128_v20 = vmax.f32 %v1091_v6, 0.0  ;;  %v3288_v14 = vpop.permute.xlu1 %1274 }
 0x264   :  { %v1092_v13 = vpop.f32.mrf.mxu2 }
 0x265   :  { %v1093_v27 = vadd.f32 %v1092_v13, %v1004_v9 }
 0x267   :  { %v1129_v2 = vmax.f32 %v1093_v27, 0.0  ;;  %v3294_v9 = vpop.permute.xlu1 %1349  ;;  %v2127_v27 = vor.u32 %v2282_v50, %v2124_v60 }
 0x269   :  { %v1178_v51 = vpack.c.bf16 %v1129_v2, %v1128_v20  ;;  %v2301_v2 = vld [vmem:[%s3524_s6 + $0xd4] sm:$0xf0] }
 0x26a   :  { %1565 = vmatmul.bf16.gmra.mxu3 %v2131_v21  ;;  %v2179_v21 = vor.u32 %v2297_v43, %v2178_v41  ;;  %v2195_v7 = vor.u32 %v2301_v2, %v2194_v46  ;;  %v2290_v43 = vld [vmem:[%s3524_s6 + $0x84] sm:$0xf] }
 0x26c   :  { %v1095_v37 = vpop.f32.mrf.mxu2 }
 0x26d   :  { %v1096_v31 = vadd.f32 %v1095_v37, %v1007_v52  ;;  %v2119_v37 = vor.u32 %v2280_v19, %v2116_v22  ;;  %v2156_v19 = vld [vmem:[%s3524_s6 + $0x88] sm:$0xf0] }
 0x26f   :  { %v1130_v54 = vmax.f32 %v1096_v31, 0.0  ;;  %v2299_v31 = vld [vmem:[%s3524_s6 + $0xc4] sm:$0xf0]  ;;  %v3314_v11 = vpop.permute.xlu1 %1334 }
 0x274   :  { %v1097_v38 = vpop.f32.mrf.mxu2 }
 0x275   :  { %v1098_v5 = vadd.f32 %v1097_v38, %v1009_v17  ;;  %v2186_v17 = vld [vmem:[%s3524_s6 + $0xc0] sm:$0xf]  ;;  %v3308_v38 = vpop.permute.xlu0 %1284 }
 0x276   :  { %v2187_v39 = vor.u32 %v2299_v31, %v2186_v17 }
 0x277   :  { %v1131_v26 = vmax.f32 %v1098_v5, 0.0  ;;  %v3310_v5 = vpop.permute.xlu2 %1264  ;;  %v3325_v32 = vpop.permute.xlu1 %1259 }
 0x279   :  { %v1179_v8 = vpack.c.bf16 %v1131_v26, %v1130_v54 }
 0x27a   :  { %1570 = vmatmul.bf16.gmra.mxu3 %v2139_v63 }
 0x27b   :  { %1621 = vmatpush.bf16.msrb.mxu0 %v1179_v8  ;;  %v2284_v8 = vld [vmem:[%s3524_s6 + $0x54] sm:$0xf] }
 0x27c   :  { %v2135_v20 = vor.u32 %v2284_v8, %v2132_v15  ;;  %v2292_v15 = vld [vmem:[%s3524_s6 + $0x94] sm:$0xf] }
 0x27d   :  { %v3316_v6 = vpop.permute.xlu0 %1359 }
 0x27f   :  { %1622 = vmatpush.bf16.msrb.mxu0 %v1178_v51  ;;  %v3318_v54 = vpop.permute.xlu2 %1339  ;;  %v3342_v23 = vpop.permute.xlu1 %1244 }
 0x283   :  { %1623 = vmatpush.bf16.msrb.mxu0 %v1177_v4 }
 0x285   :  { %v3336_v36 = vpop.permute.xlu0 %1344 }
 0x287   :  { %1624 = vmatpush.bf16.msrb.mxu0 %v1176_v53  ;;  %v3338_v49 = vpop.permute.xlu2 %1324 }
 0x28a   :  { %1575 = vmatmul.bf16.gmra.mxu3 %v2147_v44 }
 0x28b   :  { %1625 = vmatpush.bf16.msrb.mxu0 %v3186_v59  ;;  %v2092_v59 = vld [vmem:[%s3524_s6 + $0x8] sm:$0xf0] }
 0x28d   :  { %v3347_v4 = vpop.permute.xlu0 %1269 }
 0x28f   :  { %1626 = vmatpush.bf16.msrb.mxu0 %v3177_v61  ;;  %v2095_v61 = vor.u32 %v2274_v58, %v2092_v59  ;;  %v3358_v53 = vpop.permute.xlu2 %1249  ;;  %v3362_v58 = vpop.permute.xlu1 %1319 }
 0x293   :  { %1627 = vmatpush.bf16.msrb.mxu0 %v3168_v40  ;;  %v2162_v40 = vld [vmem:[%s3524_s6 + $0x90] sm:$0xf] }
 0x294   :  { %v2163_v47 = vor.u32 %v2293_v16, %v2162_v40  ;;  %v2210_v16 = vld [vmem:[%s3524_s6 + $0xf0] sm:$0xf] }
 0x295   :  { %v3364_v59 = vpop.permute.xlu0 %1254 }
 0x297   :  { %1628 = vmatpush.bf16.msrb.mxu0 %v3156_v1  ;;  %v2103_v1 = vor.u32 %v2276_v18, %v2100_v28  ;;  %v3368_v40 = vpop.permute.xlu1 %1304  ;;  %v2305_v18 = vld [vmem:[%s3524_s6 + $0xf4] sm:$0xf0]  ;;  %v2288_v28 = vld [vmem:[%s3524_s6 + $0x74] sm:$0xf] }
 0x29a   :  { %1580 = vmatmul.bf16.gmra.mxu3 %v2155_v56  ;;  %1629 = vmatmul.bf16.vlgmr.msrb.gmra.mxu0 %v2095_v61  ;;  %v1235_v56 = vpop.permute.xlu2 %1234 }
 0x29d   :  { %v3286_v13 = vpop.f32.mrf.mxu3  ;;  %v3382_v12 = vpop.permute.xlu0 %1329 }
 0x2a2   :  { %v3384_v33 = vpop.permute.xlu2 %1309 }
 0x2a5   :  { %v3292_v52 = vpop.f32.mrf.mxu3 }
 0x2aa   :  { %1585 = vmatmul.bf16.gmra.mxu3 %v2163_v47  ;;  %1634 = vmatmul.bf16.gmra.mxu0 %v2103_v1  ;;  %v2148_v47 = vld [vmem:[%s3524_s6 + $0x78] sm:$0xf0]  ;;  %v2211_v1 = vor.u32 %v2305_v18, %v2210_v16  ;;  %v3388_v41 = vpop.permute.xlu2 %1294 }
 0x2ab   :  { %v2151_v30 = vor.u32 %v2288_v28, %v2148_v47 }
 0x2ad   :  { %v3312_v63 = vpop.f32.mrf.mxu3 }
 0x2b2   :  { %v1220_v60 = vpop.permute.xlu2 %1219 }
 0x2b5   :  { %v3320_v26 = vpop.f32.mrf.mxu3 }
 0x2ba   :  { %1590 = vmatmul.bf16.gmra.mxu3 %v2171_v0  ;;  %1639 = vmatmul.bf16.gmra.mxu0 %v2111_v42  ;;  %v1230_v0 = vpop.permute.xlu1 %1229  ;;  %v3386_v42 = vpop.permute.xlu0 %1314 }
 0x2bd   :  { %v3340_v51 = vpop.f32.mrf.mxu3 }
 0x2c2   :  { %v1215_v22 = vpop.permute.xlu1 %1214  ;;  %v1240_v50 = vpop.permute.xlu0 %1239 }
 0x2c5   :  { %v3360_v44 = vpop.f32.mrf.mxu3 }
 0x2ca   :  { %1595 = vmatmul.bf16.gmra.mxu3 %v2179_v21  ;;  %1644 = vmatmul.bf16.gmra.mxu0 %v2119_v37  ;;  %v1542_v21 = vadd.f32 %v3286_v13, %v1215_v22  ;;  %v2159_v37 = vor.u32 %v2290_v43, %v2156_v19  ;;  %v2164_v13 = vld [vmem:[%s3524_s6 + $0x98] sm:$0xf0]  ;;  %v1552_v43 = vadd.f32 %v3340_v51, %v1235_v56 }
 0x2cb   :  { %v2167_v55 = vor.u32 %v2292_v15, %v2164_v13  ;;  %v2180_v51 = vld [vmem:[%s3524_s6 + $0xb8] sm:$0xf0] }
 0x2cd   :  { %v3366_v61 = vpop.f32.mrf.mxu3 }
 0x2d5   :  { %v1558_v62 = vpop.f32.mrf.mxu3 }
 0x2d6   :  { %v1559_v15 = vadd.f32 %v1558_v62, %v3358_v53 }
 0x2da   :  { %1600 = vmatmul.bf16.gmra.mxu3 %v2187_v39  ;;  %1649 = vmatmul.bf16.gmra.mxu0 %v2127_v27  ;;  %v1544_v39 = vadd.f32 %v3292_v52, %v1220_v60 }
 0x2dd   :  { %v1561_v35 = vpop.f32.mrf.mxu3 }
 0x2ea   :  { %1605 = vmatmul.bf16.gmra.mxu3 %v2195_v7  ;;  %1654 = vmatmul.bf16.gmra.mxu0 %v2135_v20  ;;  %v1225_v20 = vpop.permute.xlu0 %1224 }
 0x2eb   :  { %v1547_v34 = vadd.f32 %v3312_v63, %v1225_v20  ;;  %v2172_v63 = vld [vmem:[%s3524_s6 + $0xa8] sm:$0xf0] }
 0x2fa   :  { %1610 = vmatmul.bf16.gmra.mxu3 %v2203_v24  ;;  %1659 = vmatmul.bf16.gmra.mxu0 %v2143_v48  ;;  %v1549_v24 = vadd.f32 %v3320_v26, %v1230_v0  ;;  %v3408_v48 = vpop.f32.mrf.mxu3 }
 0x302   :  { %v3419_v22 = vpop.f32.mrf.mxu3 }
 0x30a   :  { %1615 = vmatmul.bf16.gmra.mxu3 %v2211_v1  ;;  %1664 = vmatmul.bf16.gmra.mxu0 %v2151_v30  ;;  %v2294_v1 = vld [vmem:[%s3524_s6 + $0xa4] sm:$0xf] }
 0x30b   :  { %v2175_v19 = vor.u32 %v2294_v1, %v2172_v63  ;;  %v2196_v1 = vld [vmem:[%s3524_s6 + $0xd8] sm:$0xf0] }
 0x317   :  { %v1630_v17 = vpop.f32.mrf.mxu0 }
 0x318   :  { %v1631_v31 = vadd.f32 %v1630_v17, %v1542_v21  ;;  %v1554_v21 = vadd.f32 %v3360_v44, %v1240_v50 }
 0x31a   :  { %1669 = vmatmul.bf16.gmra.mxu0 %v2159_v37  ;;  %v1710_v2 = vmax.f32 %v1631_v31, 0.0 }
 0x31f   :  { %v1632_v27 = vpop.f32.mrf.mxu0 }
 0x320   :  { %v1633_v46 = vadd.f32 %v1632_v27, %v1544_v39  ;;  %v1568_v39 = vpop.f32.mrf.mxu3  ;;  %v2296_v27 = vld [vmem:[%s3524_s6 + $0xb4] sm:$0xf] }
 0x322   :  { %v1711_v8 = vmax.f32 %v1633_v46, 0.0  ;;  %v1557_v46 = vadd.f32 %v3366_v61, %v3342_v23  ;;  %v1562_v61 = vadd.f32 %v1561_v35, %v3364_v59 }
 0x324   :  { %v3404_v7 = vpack.c.bf16 %v1711_v8, %v1710_v2  ;;  %v2183_v2 = vor.u32 %v2296_v27, %v2180_v51  ;;  %v2212_v27 = vld [vmem:[%s3524_s6 + $0xf8] sm:$0xf0] }
 0x327   :  { %v1635_v52 = vpop.f32.mrf.mxu0 }
 0x328   :  { %v1636_v45 = vadd.f32 %v1635_v52, %v1547_v34  ;;  %v1571_v8 = vpop.f32.mrf.mxu3  ;;  %v2298_v52 = vld [vmem:[%s3524_s6 + $0xc4] sm:$0xf] }
 0x32a   :  { %1674 = vmatmul.bf16.gmra.mxu0 %v2167_v55  ;;  %v1712_v28 = vmax.f32 %v1636_v45, 0.0  ;;  %v2188_v45 = vld [vmem:[%s3524_s6 + $0xc8] sm:$0xf0] }
 0x32f   :  { %v1637_v16 = vpop.f32.mrf.mxu0 }
 0x330   :  { %v1638_v18 = vadd.f32 %v1637_v16, %v1549_v24  ;;  %v2191_v24 = vor.u32 %v2298_v52, %v2188_v45  ;;  %v1573_v16 = vpop.f32.mrf.mxu3  ;;  %v1569_v45 = vadd.f32 %v1568_v39, %v3347_v4 }
 0x332   :  { %v1713_v47 = vmax.f32 %v1638_v18, 0.0 }
 0x334   :  { %v3416_v30 = vpack.c.bf16 %v1713_v47, %v1712_v28  ;;  %v2300_v47 = vld [vmem:[%s3524_s6 + $0xd4] sm:$0xf] }
 0x335   :  { %v2199_v63 = vor.u32 %v2300_v47, %v2196_v1  ;;  %v1567_v1 = vadd.f32 %v3419_v22, %v3310_v5  ;;  %v1300_v22 = vpop.permute.xlu0 %1299 }
 0x337   :  { %v1640_v26 = vpop.f32.mrf.mxu0 }
 0x338   :  { %v1641_v0 = vadd.f32 %v1640_v26, %v1552_v43  ;;  %v1576_v28 = vpop.f32.mrf.mxu3  ;;  %v2204_v26 = vld [vmem:[%s3524_s6 + $0xe8] sm:$0xf0] }
 0x33a   :  { %1679 = vmatmul.bf16.gmra.mxu0 %v2175_v19  ;;  %v1714_v31 = vmax.f32 %v1641_v0, 0.0  ;;  %v2302_v19 = vld [vmem:[%s3524_s6 + $0xe4] sm:$0xf] }
 0x33f   :  { %v1642_v37 = vpop.f32.mrf.mxu0 }
 0x340   :  { %v1643_v17 = vadd.f32 %v1642_v37, %v1554_v21  ;;  %v1578_v59 = vpop.f32.mrf.mxu3  ;;  %v2207_v21 = vor.u32 %v2302_v19, %v2204_v26 }
 0x342   :  { %v1715_v60 = vmax.f32 %v1643_v17, 0.0 }
 0x344   :  { %v3428_v56 = vpack.c.bf16 %v1715_v60, %v1714_v31  ;;  %v2304_v60 = vld [vmem:[%s3524_s6 + $0xf4] sm:$0xf] }
 0x345   :  { %v2215_v51 = vor.u32 %v2304_v60, %v2212_v27 }
 0x347   :  { %v1645_v44 = vpop.f32.mrf.mxu0 }
 0x348   :  { %v1646_v50 = vadd.f32 %v1645_v44, %v1557_v46  ;;  %v1581_v0 = vpop.f32.mrf.mxu3  ;;  %v1577_v44 = vadd.f32 %v1576_v28, %v3308_v38 }
 0x34a   :  { %1684 = vmatmul.bf16.gmra.mxu0 %v2183_v2  ;;  %v1716_v34 = vmax.f32 %v1646_v50, 0.0  ;;  %v1574_v50 = vadd.f32 %v1573_v16, %v3290_v25  ;;  %v1582_v16 = vadd.f32 %v1581_v0, %v3388_v41 }
 0x34f   :  { %v1647_v13 = vpop.f32.mrf.mxu0 }
 0x350   :  { %v1648_v20 = vadd.f32 %v1647_v13, %v1559_v15  ;;  %v1583_v17 = vpop.f32.mrf.mxu3  ;;  %v1579_v15 = vadd.f32 %v1578_v59, %v3270_v29  ;;  %v1564_v29 = vadd.f32 %v3408_v48, %v3325_v32 }
 0x352   :  { %v1717_v55 = vmax.f32 %v1648_v20, 0.0 }
 0x354   :  { %v3439_v23 = vpack.c.bf16 %v1717_v55, %v1716_v34  ;;  %v1572_v34 = vadd.f32 %v1571_v8, %v3288_v14 }
 0x357   :  { %v1650_v18 = vpop.f32.mrf.mxu0 }
 0x358   :  { %v3442_v53 = vadd.f32 %v1650_v18, %v1562_v61  ;;  %v1586_v2 = vpop.f32.mrf.mxu3 }
 0x359   :  { %v1587_v60 = vadd.f32 %v1586_v2, %v3368_v40 }
 0x35a   :  { %1689 = vmatmul.bf16.gmra.mxu0 %v2191_v24 }
 0x35f   :  { %v1652_v62 = vpop.f32.mrf.mxu0 }
 0x360   :  { %v1588_v47 = vpop.f32.mrf.mxu3  ;;  %v1653_v4 = vadd.f32 %v1652_v62, %v1564_v29 }
 0x367   :  { %v1655_v43 = vpop.f32.mrf.mxu0 }
 0x368   :  { %v1656_v14 = vadd.f32 %v1655_v43, %v1567_v1 }
 0x36a   :  { %1694 = vmatmul.bf16.gmra.mxu0 %v2199_v63  ;;  %v1720_v26 = vmax.f32 %v1656_v14, 0.0 }
 0x36f   :  { %v1657_v35 = vpop.f32.mrf.mxu0 }
 0x370   :  { %v1658_v38 = vadd.f32 %v1657_v35, %v1569_v45  ;;  %v1591_v35 = vpop.f32.mrf.mxu3 }
 0x372   :  { %v1721_v39 = vmax.f32 %v1658_v38, 0.0 }
 0x374   :  { %v1749_v5 = vpack.c.bf16 %v1721_v39, %v1720_v26 }
 0x377   :  { %v1660_v37 = vpop.f32.mrf.mxu0 }
 0x378   :  { %v1661_v61 = vadd.f32 %v1660_v37, %v1572_v34  ;;  %v1584_v37 = vadd.f32 %v1583_v17, %v1300_v22  ;;  %v1593_v27 = vpop.f32.mrf.mxu3  ;;  %v2218_v17 = vld [vmem:[%s3526_s8] sm:$0xf] }
 0x37a   :  { %1699 = vmatmul.bf16.gmra.mxu0 %v2207_v21  ;;  %v1722_v8 = vmax.f32 %v1661_v61, 0.0  ;;  %v1719_v21 = vmax.f32 %v1653_v4, 0.0 }
 0x37f   :  { %v1662_v31 = vpop.f32.mrf.mxu0 }
 0x380   :  { %v1663_v55 = vadd.f32 %v1662_v31, %v1574_v50  ;;  %v1718_v31 = vmax.f32 %v3442_v53, 0.0  ;;  %v1589_v53 = vadd.f32 %v1588_v47, %v3384_v33  ;;  %v1592_v33 = vadd.f32 %v1591_v35, %v3386_v42 }
 0x382   :  { %v1723_v28 = vmax.f32 %v1663_v55, 0.0  ;;  %v1748_v41 = vpack.c.bf16 %v1719_v21, %v1718_v31  ;;  %v1594_v55 = vadd.f32 %v1593_v27, %v3362_v58 }
 0x384   :  { %v1750_v59 = vpack.c.bf16 %v1723_v28, %v1722_v8 }
 0x387   :  { %v1665_v46 = vpop.f32.mrf.mxu0 }
 0x388   :  { %v1666_v13 = vadd.f32 %v1665_v46, %v1577_v44  ;;  %v2307_v44 = vld [vmem:[%s3526_s8 + $0x4] sm:$0xf0] }
 0x389   :  { %v2219_v50 = vor.u32 %v2307_v44, %v2218_v17 }
 0x38a   :  { %1704 = vmatmul.bf16.gmra.mxu0 %v2215_v51  ;;  %v1724_v24 = vmax.f32 %v1666_v13, 0.0 }
 0x38f   :  { %v1667_v20 = vpop.f32.mrf.mxu0 }
 0x390   :  { %v1668_v52 = vadd.f32 %v1667_v20, %v1579_v15 }
 0x392   :  { %v1725_v18 = vmax.f32 %v1668_v52, 0.0 }
 0x394   :  { %v1751_v25 = vpack.c.bf16 %v1725_v18, %v1724_v24 }
 0x396   :  { %1782 = vmatpush.bf16.msra.mxu1 %v1751_v25 }
 0x397   :  { %v1670_v63 = vpop.f32.mrf.mxu0 }
 0x398   :  { %v1671_v19 = vadd.f32 %v1670_v63, %v1582_v16 }
 0x39a   :  { %1783 = vmatpush.bf16.msra.mxu1 %v1750_v59  ;;  %v1726_v43 = vmax.f32 %v1671_v19, 0.0 }
 0x39e   :  { %1784 = vmatpush.bf16.msra.mxu1 %v1749_v5 }
 0x39f   :  { %v1672_v32 = vpop.f32.mrf.mxu0 }
 0x3a0   :  { %v1673_v48 = vadd.f32 %v1672_v32, %v1584_v37 }
 0x3a2   :  { %v1727_v0 = vmax.f32 %v1673_v48, 0.0  ;;  %1785 = vmatpush.bf16.msra.mxu1 %v1748_v41 }
 0x3a4   :  { %v3473_v62 = vpack.c.bf16 %v1727_v0, %v1726_v43 }
 0x3a6   :  { %1786 = vmatpush.bf16.msra.mxu1 %v3439_v23  ;;  %v1596_v23 = vpop.f32.mrf.mxu3 }
 0x3a7   :  { %v1675_v51 = vpop.f32.mrf.mxu0  ;;  %v1597_v1 = vadd.f32 %v1596_v23, %v3338_v49 }
 0x3a8   :  { %v1676_v46 = vadd.f32 %v1675_v51, %v1587_v60 }
 0x3aa   :  { %1787 = vmatpush.bf16.msra.mxu1 %v3428_v56  ;;  %v1728_v15 = vmax.f32 %v1676_v46, 0.0 }
 0x3ae   :  { %1788 = vmatpush.bf16.msra.mxu1 %v3416_v30  ;;  %v1598_v34 = vpop.f32.mrf.mxu3 }
 0x3af   :  { %v1677_v40 = vpop.f32.mrf.mxu0  ;;  %v1599_v28 = vadd.f32 %v1598_v34, %v3382_v12 }
 0x3b0   :  { %v1678_v2 = vadd.f32 %v1677_v40, %v1589_v53 }
 0x3b2   :  { %v1729_v13 = vmax.f32 %v1678_v2, 0.0  ;;  %1789 = vmatpush.bf16.msra.mxu1 %v3404_v7 }
 0x3b4   :  { %v3487_v56 = vpack.c.bf16 %v1729_v13, %v1728_v15 }
 0x3b5   :  { %1790 = vmatmul.bf16.vlgmr.msra.gmra.mxu1 %v2219_v50 }
 0x3b6   :  { %v1601_v47 = vpop.f32.mrf.mxu3 }
 0x3b7   :  { %v1680_v30 = vpop.f32.mrf.mxu0  ;;  %v1602_v58 = vadd.f32 %v1601_v47, %v3314_v11 }
 0x3b8   :  { %v1681_v20 = vadd.f32 %v1680_v30, %v1592_v33 }
 0x3ba   :  { %v1730_v61 = vmax.f32 %v1681_v20, 0.0 }
 0x3be   :  { %v1603_v25 = vpop.f32.mrf.mxu3 }
 0x3bf   :  { %v1682_v52 = vpop.f32.mrf.mxu0 }
 0x3c0   :  { %v1683_v45 = vadd.f32 %v1682_v52, %v1594_v55 }
 0x3c2   :  { %v1731_v24 = vmax.f32 %v1683_v45, 0.0 }
 0x3c4   :  { %v1754_v18 = vpack.c.bf16 %v1731_v24, %v1730_v61  ;;  %v1770_v61 = vpop.permute.xlu0 %1769 }
 0x3c6   :  { %v1606_v39 = vpop.f32.mrf.mxu3 }
 0x3c7   :  { %v1685_v38 = vpop.f32.mrf.mxu0  ;;  %v1607_v44 = vadd.f32 %v1606_v39, %v3336_v36  ;;  %v2220_v36 = vld [vmem:[%s3526_s8 + $0x8] sm:$0xf0] }
 0x3c8   :  { %v1686_v7 = vadd.f32 %v1685_v38, %v1597_v1 }
 0x3ca   :  { %v1732_v16 = vmax.f32 %v1686_v7, 0.0  ;;  %v1765_v7 = vpop.permute.xlu1 %1764 }
 0x3ce   :  { %v1608_v19 = vpop.f32.mrf.mxu3 }
 0x3cf   :  { %v1687_v29 = vpop.f32.mrf.mxu0  ;;  %v1609_v51 = vadd.f32 %v1608_v19, %v3294_v9 }
 0x3d0   :  { %v1688_v42 = vadd.f32 %v1687_v29, %v1599_v28  ;;  %v1814_v29 = vld [vmem:[%s3519_s1] sm:$0xff]  ;;  %s2379_s1 = smov [#allocation4]  }
 0x3d1   :  { %v1817_v19 = vmul.f32 %v1814_v29, %v1814_v29  ;;  %s1860_s10 = sshll.u32 %s2379_s1, 4  ;;  %s1861_s10 = int_to_ptr.vmem [resolvable:$true] %s1860_s10 }
 0x3d2   :  { %v1733_v14 = vmax.f32 %v1688_v42, 0.0 }
 0x3d4   :  { %v1755_v8 = vpack.c.bf16 %v1733_v14, %v1732_v16 }
 0x3d6   :  { %v1611_v21 = vpop.f32.mrf.mxu3 }
 0x3d7   :  { %v1690_v63 = vpop.f32.mrf.mxu0  ;;  %v1612_v0 = vadd.f32 %v1611_v21, %v3275_v57 }
 0x3d8   :  { %v1691_v4 = vadd.f32 %v1690_v63, %v1602_v58 }
 0x3da   :  { %v1734_v30 = vmax.f32 %v1691_v4, 0.0 }
 0x3de   :  { %v1613_v5 = vpop.f32.mrf.mxu3 }
 0x3df   :  { %v1692_v59 = vpop.f32.mrf.mxu0  ;;  %v1614_v41 = vadd.f32 %v1613_v5, %v3316_v6  ;;  %v1604_v6 = vadd.f32 %v1603_v25, %v3318_v54  ;;  %v2306_v54 = vld [vmem:[%s3526_s8 + $0x4] sm:$0xf] }
 0x3e0   :  { %v2223_v34 = vor.u32 %v2306_v54, %v2220_v36 }
 0x3e1   :  { %v1693_v50 = vadd.f32 %v1692_v59, %v1604_v6 }
 0x3e3   :  { %v1735_v33 = vmax.f32 %v1693_v50, 0.0 }
 0x3e5   :  { %v1756_v20 = vpack.c.bf16 %v1735_v33, %v1734_v30 }
 0x3e6   :  { %v1616_v12 = vpop.f32.mrf.mxu3 }
 0x3e7   :  { %v1695_v26 = vpop.f32.mrf.mxu0  ;;  %v1617_v32 = vadd.f32 %v1616_v12, %v3254_v3 }
 0x3e8   :  { %v1696_v23 = vadd.f32 %v1695_v26, %v1607_v44  ;;  %v1818_v26 = vmul.f32 -0.5, %v1817_v19 }
 0x3ea   :  { %v1736_v13 = vmax.f32 %v1696_v23, 0.0 }
 0x3ee   :  { %v1618_v31 = vpop.f32.mrf.mxu3 }
 0x3ef   :  { %v1697_v49 = vpop.f32.mrf.mxu0  ;;  %v1619_v11 = vadd.f32 %v1618_v31, %v3268_v10 }
 0x3f0   :  { %v1698_v40 = vadd.f32 %v1697_v49, %v1609_v51 }
 0x3f2   :  { %v1737_v15 = vmax.f32 %v1698_v40, 0.0 }
 0x3f4   :  { %v1757_v9 = vpack.c.bf16 %v1737_v15, %v1736_v13 }
 0x3f7   :  { %v1700_v22 = vpop.f32.mrf.mxu0 }
 0x3f8   :  { %v1701_v46 = vadd.f32 %v1700_v22, %v1612_v0 }
 0x3fa   :  { %v1738_v10 = vmax.f32 %v1701_v46, 0.0 }
 0x3ff   :  { %v1702_v35 = vpop.f32.mrf.mxu0 }
 0x400   :  { %v1703_v60 = vadd.f32 %v1702_v35, %v1614_v41 }
 0x402   :  { %v1739_v2 = vmax.f32 %v1703_v60, 0.0 }
 0x404   :  { %v1758_v57 = vpack.c.bf16 %v1739_v2, %v1738_v10 }
 0x407   :  { %v1705_v37 = vpop.f32.mrf.mxu0 }
 0x408   :  { %v1706_v48 = vadd.f32 %v1705_v37, %v1617_v32 }
 0x40a   :  { %v1740_v53 = vmax.f32 %v1706_v48, 0.0 }
 0x40f   :  { %v1707_v43 = vpop.f32.mrf.mxu0 }
 0x410   :  { %v1708_v27 = vadd.f32 %v1707_v43, %v1619_v11 }
 0x412   :  { %v1741_v17 = vmax.f32 %v1708_v27, 0.0 }
 0x414   :  { %v1759_v3 = vpack.c.bf16 %v1741_v17, %v1740_v53 }
 0x416   :  { %1796 = vmatpush.bf16.msra.mxu2 %v1759_v3 }
 0x41a   :  { %1797 = vmatpush.bf16.msra.mxu2 %v1758_v57 }
 0x41e   :  { %1798 = vmatpush.bf16.msra.mxu2 %v1757_v9 }
 0x422   :  { %1799 = vmatpush.bf16.msra.mxu2 %v1756_v20 }
 0x426   :  { %1800 = vmatpush.bf16.msra.mxu2 %v1755_v8 }
 0x42a   :  { %1801 = vmatpush.bf16.msra.mxu2 %v1754_v18 }
 0x42e   :  { %1802 = vmatpush.bf16.msra.mxu2 %v3487_v56 }
 0x432   :  { %1803 = vmatpush.bf16.msra.mxu2 %v3473_v62  ;;  %v1791_v55 = vpop.f32.mrf.mxu1 }
 0x433   :  { %v1792_v28 = vadd.f32 %v1791_v55, %v1765_v7 }
 0x435   :  { %1804 = vmatmul.bf16.vlgmr.msra.gmra.mxu2 %v2223_v34 }
 0x43a   :  { %v1793_v45 = vpop.f32.mrf.mxu1 }
 0x43b   :  { %v1794_v24 = vadd.f32 %v1793_v45, %v1770_v61 }
 0x4b8   :  { %v1805_v52 = vpop.f32.mrf.mxu2 }
 0x4b9   :  { %v1806_v62 = vadd.f32 %v1805_v52, %v1792_v28 }
 0x4c0   :  { %v1807_v18 = vpop.f32.mrf.mxu2 }
 0x4c1   :  { %v1808_v47 = vadd.f32 %v1807_v18, %v1794_v24 }
 0x4c3   :  { %v1810_v56 = vmax.f32 %v1808_v47, -20.0 }
 0x4c5   :  { %v1811_v1 = vmin.f32 %v1810_v56, 2.0 }
 0x4c7   :  { %v1812_v38 = vmul.f32 1.442695, %v1811_v1  ;;  %v1819_v22 = vsub.f32 %v1818_v26, %v1811_v1 }
 0x4c9   :  { %2317 = vpow2.f32 %v1812_v38  ;;  %v2224_v31 = vadd.f32 -0.9189385, %v1819_v22 }
 0x4cf   :  { %v2318_v25 = vpop.eup %2317 }
 0x4d0   :  { %v1815_v42 = vmul.f32 %v2318_v25, %v1814_v29 }
 0x4d2   :  { %v1816_v16 = vadd.f32 %v1815_v42, %v1806_v62 }
 0x4d4   :  { %v1823_v14 = vmul.f32 -2.0, %v1816_v16  ;;  %2319 = vtanh.f32 %v1816_v16  ;;  %v1822_v35 = vsub.f32 0.6931472, %v1816_v16 }
 0x4d6   :  { %v1825_v8 = vand.u32 2147483647, %v1823_v14  ;;  %v1824_v49 = vmax.f32 %v1823_v14, 0.0 }
 0x4d8   :  { %v1826_v58 = vsub.f32 0.0, %v1825_v8 }
 0x4da   :  { %v2320_v63 = vpop.eup %2319  ;;  %v1827_v4 = vmul.f32 1.442695, %v1826_v58 }
 0x4db   :  { %1843 = vst [vmem:[#allocation2] sm:$0xff] %v2320_v63 }
 0x4dc   :  { %2321 = vpow2.f32 %v1827_v4  ;;  %1854 = dma.vmem_to_hbm [thread:$0]  %s1850_s5, 128, %s1852_s22, [#allocation3]  }
 0x4e2   :  { %v2322_v39 = vpop.eup %2321 }
 0x4e3   :  { %v1829_v59 = vadd.f32 1.0, %v2322_v39 }
 0x4e5   :  { %2323 = vlog2.f32 %v1829_v59 }
 0x4eb   :  { %v2324_v21 = vpop.eup %2323 }
 0x4ec   :  { %v1831_v5 = vmul.f32 0.6931472, %v2324_v21 }
 0x4ee   :  { %v1832_v12 = vadd.f32 %v1831_v5, %v1824_v49 }
 0x4f0   :  { %v1833_v37 = vsub.f32 %v1822_v35, %v1832_v12 }
 0x4f2   :  { %v1834_v32 = vmul.f32 2.0, %v1833_v37 }
 0x4f4   :  { %v1835_v41 = vsub.f32 %v2224_v31, %v1834_v32 }
 0x4f6   :  { %v1836_v11 = vrot.slane %v1835_v41, 4 }
 0x4f8   :  { %v1837_v48 = vadd.f32 %v1836_v11, %v1835_v41 }
 0x4fa   :  { %v1838_v43 = vrot.slane %v1837_v48, 2 }
 0x4fc   :  { %v1839_v0 = vadd.f32 %v1838_v43, %v1837_v48 }
 0x4fe   :  { %v1840_v60 = vrot.slane %v1839_v0, 1 }
 0x500   :  { %v1841_v27 = vadd.f32 %v1840_v60, %v1839_v0 }
 0x502   :  { %1842 = vst [vmem:[#allocation4] sm:$0x1] %v1841_v27 }
 0x503   :  { %1865 = dma.vmem_to_hbm [thread:$0]  %s1861_s10, 16, %s1863_s24, [#allocation5]  }
 0x504   :  { %2373 = dma.done.wait [#allocation3], 128  }
 0x505   :  { %2374 = vsyncadd [#allocation3], 4294967168 }
 0x506   :  { %2375 = dma.done.wait [#allocation5], 16  }
 0x507   :  { %2376 = vsyncadd [#allocation5], 4294967280 }
 0x508   :  { %1874 = vsyncpa [#allocation3], 1 }
 0x509   :  { %1875 = vsyncpa [#allocation5], 1 }

</bundles_post_ra>
